<compile_context>
chip_gen: v7x
topology: tpu7x:2x2x1
jax: 0.10.0
libtpu: 0.0.40
codegen_flags: <defaults>
</compile_context>

<pallas_src>
import functools

import jax
import jax.numpy as jnp
from jax.experimental import pallas as pl
from jax.experimental.pallas import tpu as pltpu


_TN = 128           # Cout tile (lane dim) -> lane-dense stores
_TARGET_ROWS = 256  # target rows per output tile (~32 f32 vregs accumulator)
_SUBMUL = 16        # flat-row-width multiple so bf16/f32 tiled blocks are legal


def _ceil_to(a, m):
    return -(-a // m) * m


# ----------------------------------------------------------------------------
# Pallas kernel: implicit-im2col conv + folded-BN bias (+ fused 1x1 shortcut)
# (+ residual) (+ relu)
# ----------------------------------------------------------------------------
def _make_conv_kernel(k, s, th, wflat, apply_relu, add_res, fuse_short):
    def kernel(*refs):
        refs = list(refs)
        x_ref, w_ref, b_ref = refs[:3]
        idx = 3
        if fuse_short:
            xs_ref, ws_ref = refs[idx], refs[idx + 1]
            idx += 2
        if add_res:
            res_ref = refs[idx]
            idx += 1
        o_ref = refs[idx]

        tn = o_ref.shape[-1]
        rows = th * wflat
        # first flat row of the output tile handled by this grid step
        base = pl.multiple_of(pl.program_id(2) * rows, rows)

        # accumulator starts from the folded-BN (merged) bias: saves one full
        # (rows, tn) zero-fill and one full-tile add per grid step.
        acc = jnp.broadcast_to(b_ref[...], (rows, tn)).astype(jnp.float32)

        # k*k accumulating MXU matmuls against the VMEM-resident image
        # (in-kernel im2col; only VMEM reads are replicated, not HBM).
        for kh in range(k):
            for kw in range(k):
                off = (kh // s) * wflat + (kw // s)
                lhs = x_ref[0, kh % s, kw % s, pl.ds(base + off, rows), :]
                # .astype is a no-op when the image is already stored in bf16.
                acc = acc + jnp.dot(lhs.astype(jnp.bfloat16),
                                    w_ref[kh * k + kw],
                                    preferred_element_type=jnp.float32)

        if fuse_short:
            # fused 1x1 projection shortcut (its BN bias is merged into b_ref)
            acc = acc + jnp.dot(xs_ref[0], ws_ref[...],
                                preferred_element_type=jnp.float32)
        if add_res:
            acc = acc + res_ref[0].astype(jnp.float32)
        if apply_relu:
            acc = jnp.maximum(acc, 0.0)
        o_ref[0] = acc.astype(o_ref.dtype)

    return kernel


# ----------------------------------------------------------------------------
# ConvNormLayer wrapper: layout prep (pad / phase-split / flatten) + pallas_call
# ----------------------------------------------------------------------------
def conv_norm_pallas(x_nhwc, w_oihw, bn_scale, bn_bias, *, stride, act_relu,
                     residual=None, fused_short=None, out_dtype=None,
                     img_dtype=None):
    if img_dtype is None:
        img_dtype = _image_dtype()

    n, h, w, cin = x_nhwc.shape
    cout, cin_w, k, _ = w_oihw.shape
    assert cin_w == cin
    s = stride
    p = (k - 1) // 2
    ho = (h + 2 * p - k) // s + 1
    wo = (w + 2 * p - k) // s + 1
    hp, wp = h + 2 * p, w + 2 * p
    hps = _ceil_to(hp, s) // s
    # Pad flat row width to a multiple of 16 so (a) any th keeps bf16/f32
    # block shapes legal and (b) rows lands near _TARGET_ROWS (accumulator
    # stays <= ~32 f32 vregs instead of spilling at awkward widths).
    wps = _ceil_to(_ceil_to(wp, s) // s, _SUBMUL)

    cpad = _ceil_to(cout, _TN)
    th = max(1, min(_TARGET_ROWS // wps, ho))
    hopad = _ceil_to(ho, th)
    rows = th * wps

    # ---- activations: pad -> split by stride phase -> flatten spatial -------
    # element [b, ph, pw, hb*wps + wb, c] == padded_x[b, hb*s+ph, wb*s+pw, c]
    xp = jnp.pad(x_nhwc.astype(img_dtype),
                 ((0, 0), (p, hps * s - hp + p), (p, wps * s - wp + p), (0, 0)))
    xf = xp.reshape(n, hps, s, wps, s, cin).transpose(0, 2, 4, 1, 3, 5)
    xf = xf.reshape(n, s, s, hps * wps, cin)
    lreq = (hopad + (k - 1) // s) * wps + (k - 1) // s
    if lreq > hps * wps:
        xf = jnp.pad(xf, ((0, 0), (0, 0), (0, 0), (0, lreq - hps * wps), (0, 0)))
    lflat = xf.shape[3]

    # ---- weights: fold BN scale, OIHW -> (k*k, Cin, Cpad), bf16 -------------
    wf = jnp.transpose(w_oihw, (2, 3, 1, 0)) * bn_scale[None, None, None, :]
    wf = jnp.pad(wf, ((0, 0), (0, 0), (0, 0), (0, cpad - cout)))
    wf = wf.reshape(k * k, cin, cpad).astype(jnp.bfloat16)

    bias_vec = bn_bias
    add_res = residual is not None
    fuse_short = fused_short is not None

    extra_inputs, extra_specs = [], []
    short_flops = 0
    if fuse_short:
        sx, sw, ssc, sbias, sstr = fused_short
        cin_s = sx.shape[-1]
        assert sw.shape == (cout, cin_s, 1, 1)
        # 1x1 / stride-sstr projection == strided sampling of sx laid out in
        # this conv's flat output tiling; rides as one extra MXU matmul
        # (removes a whole pallas_call and an HBM round trip of `short`).
        xs = sx[:, ::sstr, ::sstr, :][:, :ho, :wo, :].astype(jnp.bfloat16)
        xs = jnp.pad(xs, ((0, 0), (0, hopad - ho), (0, wps - wo), (0, 0)))
        xs = xs.reshape(n, hopad * wps, cin_s)
        ws = (sw[:, :, 0, 0] * ssc[:, None]).T            # (cin_s, cout) scaled
        ws = jnp.pad(ws, ((0, 0), (0, cpad - cout))).astype(jnp.bfloat16)
        bias_vec = bias_vec + sbias                       # merged per-ch bias
        extra_inputs += [xs, ws]
        extra_specs += [
            pl.BlockSpec((1, rows, cin_s), lambda b, j, i: (b, i, 0)),
            pl.BlockSpec((cin_s, _TN), lambda b, j, i: (0, j)),
        ]
        short_flops = 2 * n * hopad * wps * cin_s * cpad
    if add_res:
        rf = jnp.pad(residual,
                     ((0, 0), (0, hopad - ho), (0, wps - wo), (0, cpad - cout)))
        rf = rf.reshape(n, hopad * wps, cpad)
        extra_inputs.append(rf)
        extra_specs.append(pl.BlockSpec((1, rows, _TN),
                                        lambda b, j, i: (b, i, j)))

    bias = jnp.pad(bias_vec, (0, cpad - cout)).reshape(1, cpad).astype(jnp.float32)

    inputs = [xf, wf, bias] + extra_inputs
    in_specs = [
        # whole phase-split image per batch element; block index ignores (j, i)
        # so it is DMA'd only when b changes.
        # TODO(synk): single-buffer / halo-row-tile this block for very large
        # feature maps (v7x 64 MiB VMEM); auto double-buffering is kept here.
        pl.BlockSpec((1, s, s, lflat, cin), lambda b, j, i: (b, 0, 0, 0, 0)),
        pl.BlockSpec((k * k, cin, _TN), lambda b, j, i: (0, 0, j)),
        pl.BlockSpec((1, _TN), lambda b, j, i: (0, j)),
    ] + extra_specs

    out_dtype = x_nhwc.dtype if out_dtype is None else out_dtype
    flops = 2 * n * hopad * wps * cin * cpad * k * k + short_flops
    bytes_accessed = sum(int(a.size) * a.dtype.itemsize for a in inputs)
    bytes_accessed += n * hopad * wps * cpad * jnp.dtype(out_dtype).itemsize

    out = pl.pallas_call(
        _make_conv_kernel(k, s, th, wps, act_relu, add_res, fuse_short),
        out_shape=jax.ShapeDtypeStruct((n, hopad * wps, cpad), out_dtype),
        grid_spec=pltpu.PrefetchScalarGridSpec(
            num_scalar_prefetch=0,
            grid=(n, cpad // _TN, hopad // th),
            in_specs=in_specs,
            out_specs=pl.BlockSpec((1, rows, _TN), lambda b, j, i: (b, i, j)),
        ),
        compiler_params=pltpu.CompilerParams(
            # split megacore on batch / Cout tiles, not on the row axis (that
            # would duplicate the per-batch image DMA on both cores).
            dimension_semantics=("parallel", "parallel", "arbitrary"),
            # <= ~48 MiB stays safe on v7x (64 MiB VMEM); raise on v5e/v6e
            # (128 MiB) for very large feature maps.
            vmem_limit_bytes=48 * 1024 * 1024,
        ),
        cost_estimate=pl.CostEstimate(flops=int(flops), transcendentals=0,
                                      bytes_accessed=int(bytes_accessed)),
    )(*inputs)

    # drop padded rows / garbage columns / padded channels
    # TODO(synk): chain layers in this padded flat layout to avoid the XLA
    # slice/re-pad/re-flatten HBM round trips between ConvNormLayers.
    out = out.reshape(n, hopad, wps, cpad)[:, :ho, :wo, :cout]
    return out


# ----------------------------------------------------------------------------
# One-time probe: use a bf16 image (half DMA/VMEM) if this Mosaic build lowers
# unaligned dynamic bf16 sublane slices correctly; otherwise fall back to f32.
# ----------------------------------------------------------------------------
_IMG_DTYPE = [None]


def _image_dtype():
    if _IMG_DTYPE[0] is None:
        _IMG_DTYPE[0] = jnp.float32
        try:
            cin, cout, hh = 8, 8, 24
            # exactly bf16-representable values -> exact match expected
            x = ((jnp.arange(hh * hh * cin) % 13).astype(jnp.float32) * 0.25
                 ).reshape(1, hh, hh, cin)
            w = ((jnp.arange(cout * cin * 9) % 5).astype(jnp.float32) * 0.125
                 - 0.25).reshape(cout, cin, 3, 3)
            sc = jnp.ones((cout,), jnp.float32)
            bi = jnp.zeros((cout,), jnp.float32)
            got = conv_norm_pallas(x, w, sc, bi, stride=1, act_relu=False,
                                   img_dtype=jnp.bfloat16)
            jax.block_until_ready(got)
            ref = jax.lax.conv_general_dilated(
                x, w, (1, 1), [(1, 1), (1, 1)],
                dimension_numbers=("NHWC", "OIHW", "NHWC"),
                precision=jax.lax.Precision.HIGHEST)
            if bool(jnp.allclose(got, ref, atol=1e-3, rtol=1e-3)):
                _IMG_DTYPE[0] = jnp.bfloat16
        except Exception:
            _IMG_DTYPE[0] = jnp.float32
    return _IMG_DTYPE[0]


# ----------------------------------------------------------------------------
# BasicBlock parameters + forward
# ----------------------------------------------------------------------------
def _conv_bn_params(key, cin, cout, k, eps=1e-5):
    kw_, kg, kb, km, kv = jax.random.split(key, 5)
    w = 0.1 * jax.random.normal(kw_, (cout, cin, k, k), jnp.float32)
    gamma = 1.0 + 0.1 * jax.random.normal(kg, (cout,), jnp.float32)
    beta = 0.1 * jax.random.normal(kb, (cout,), jnp.float32)
    running_mean = 0.1 * jax.random.normal(km, (cout,), jnp.float32)
    running_var = jnp.abs(jax.random.normal(kv, (cout,), jnp.float32)) + 0.5
    scale = gamma / jnp.sqrt(running_var + eps)
    bias = beta - running_mean * scale
    return {"w": w, "scale": scale, "bias": bias}


def init_basic_block_params(key, ch_in, ch_out, shortcut):
    k1, k2, k3 = jax.random.split(key, 3)
    params = {
        "branch2a": _conv_bn_params(k1, ch_in, ch_out, 3),
        "branch2b": _conv_bn_params(k2, ch_out, ch_out, 3),
    }
    if not shortcut:
        params["short"] = _conv_bn_params(k3, ch_in, ch_out, 1)  # variant 'b'
    return params


def basic_block_forward(params, x_nchw, *, stride, shortcut):
    # NOTE: for multi-block networks keep activations NHWC end-to-end and only
    # transpose at model boundaries; NCHW here matches the PyTorch interface.
    x = jnp.transpose(x_nchw, (0, 2, 3, 1))  # NCHW -> NHWC

    # branch2a: 3x3 conv stride s + BN + relu (bf16 intermediate in HBM)
    out = conv_norm_pallas(
        x, params["branch2a"]["w"], params["branch2a"]["scale"],
        params["branch2a"]["bias"], stride=stride, act_relu=True,
        out_dtype=jnp.bfloat16)

    if shortcut:
        assert stride == 1 and x.shape[-1] == params["branch2a"]["w"].shape[0], (
            "identity shortcut requires stride == 1 and ch_in == ch_out")
        residual, fused_short = x, None
    else:
        # TODO(synk): variant 'd' (AvgPool + 1x1 stride-1) shortcut not
        # implemented; variant 'b' 1x1 conv is fused into the branch2b kernel.
        residual = None
        fused_short = (x, params["short"]["w"], params["short"]["scale"],
                       params["short"]["bias"], stride)

    # branch2b: 3x3 conv stride 1 + BN, fused with the shortcut and final relu
    out = conv_norm_pallas(
        out, params["branch2b"]["w"], params["branch2b"]["scale"],
        params["branch2b"]["bias"], stride=1, act_relu=True,
        residual=residual, fused_short=fused_short, out_dtype=x_nchw.dtype)

    return jnp.transpose(out, (0, 3, 1, 2))  # NHWC -> NCHW


# ----------------------------------------------------------------------------
# Pure-JAX reference (same rounding points) for a correctness check
# ----------------------------------------------------------------------------
def _ref_conv_norm(x_nhwc, w_oihw, scale, bias, stride, relu, img_dt):
    p = (w_oihw.shape[2] - 1) // 2
    xb = x_nhwc.astype(img_dt).astype(jnp.float32)
    wb = (w_oihw * scale[:, None, None, None]).astype(jnp.bfloat16)
    wb = wb.astype(jnp.float32)
    y = jax.lax.conv_general_dilated(
        xb, wb, (stride, stride), [(p, p), (p, p)],
        dimension_numbers=("NHWC", "OIHW", "NHWC"),
        precision=jax.lax.Precision.HIGHEST)
    y = y + bias[None, None, None, :]
    if relu:
        y = jnp.maximum(y, 0.0)
    return y


def _ref_forward(params, x_nchw, *, stride, shortcut):
    img_dt = _image_dtype()
    x = jnp.transpose(x_nchw, (0, 2, 3, 1))
    a = _ref_conv_norm(x, params["branch2a"]["w"], params["branch2a"]["scale"],
                       params["branch2a"]["bias"], stride, True, img_dt)
    a = a.astype(jnp.bfloat16).astype(jnp.float32)
    b = _ref_conv_norm(a, params["branch2b"]["w"], params["branch2b"]["scale"],
                       params["branch2b"]["bias"], 1, False, img_dt)
    if shortcut:
        sh = x
    else:
        xs = x[:, ::stride, ::stride, :].astype(jnp.bfloat16).astype(jnp.float32)
        w1 = params["short"]["w"][:, :, 0, 0] * params["short"]["scale"][:, None]
        w1 = w1.astype(jnp.bfloat16).astype(jnp.float32)
        sh = jnp.einsum("nhwc,oc->nhwo", xs, w1,
                        precision=jax.lax.Precision.HIGHEST)
        sh = sh + params["short"]["bias"][None, None, None, :]
    y = jnp.maximum(b + sh, 0.0)
    return jnp.transpose(y, (0, 3, 1, 2))


if __name__ == "__main__":
    _image_dtype()  # run the bf16-image probe eagerly, before any jit tracing

    N, H, W = 2, 16, 16
    configs = [
        # (ch_in, ch_out, stride, shortcut)
        (4, 8, 2, False),   # projection shortcut (1x1 conv fused into branch2b)
        (8, 8, 1, True),    # identity shortcut (residual add fused)
    ]

    key = jax.random.PRNGKey(0)
    for ch_in, ch_out, stride, shortcut in configs:
        key, kx, kp = jax.random.split(key, 3)
        x = jax.random.normal(kx, (N, ch_in, H, W), jnp.float32)
        params = init_basic_block_params(kp, ch_in, ch_out, shortcut)

        fwd = jax.jit(functools.partial(basic_block_forward, stride=stride,
                                        shortcut=shortcut))
        out = fwd(params, x)
        jax.block_until_ready(out)

        assert out.shape == (N, ch_out, H // stride, W // stride), out.shape
        assert bool(jnp.all(out >= 0.0))          # final relu
        assert bool(jnp.all(jnp.isfinite(out)))

        ref = _ref_forward(params, x, stride=stride, shortcut=shortcut)
        err = float(jnp.max(jnp.abs(out - ref)))
        assert bool(jnp.allclose(out, ref, atol=3e-2, rtol=3e-2)), err

    print("KERNEL_OK")
</pallas_src>

<mosaic_0001>
module attributes {stable_mosaic.version = 11 : i64} {
  func.func @kernel(%arg0: i32, %arg1: i32, %arg2: i32, %arg3: memref<1x1x1x834x8xbf16, #tpu.memory_space<vmem>>, %arg4: memref<9x8x128xbf16, #tpu.memory_space<vmem>>, %arg5: memref<1x128xf32, #tpu.memory_space<vmem>>, %arg6: memref<1x256x128xf32, #tpu.memory_space<vmem>>) attributes {dimension_semantics = [#tpu.dimension_semantics<parallel>, #tpu.dimension_semantics<parallel>, #tpu.dimension_semantics<arbitrary>], iteration_bounds = array<i64: 1, 1, 3>, scalar_prefetch = 0 : i64, scratch_operands = 0 : i64, tpu.core_type = #tpu.core_type<tc>, window_params = [{transform_indices = @transform_0, window_bounds = array<i64: 1, 1, 1, 834, 8>}, {transform_indices = @transform_1, window_bounds = array<i64: 9, 8, 128>}, {transform_indices = @transform_2, window_bounds = array<i64: 1, 128>}, {transform_indices = @transform_3, window_bounds = array<i64: 1, 256, 128>}]} {
    %c256_i32 = arith.constant 256 : i32
    %0 = arith.muli %arg2, %c256_i32 : i32
    %1 = tpu.assume_multiple %0, 256 : i32
    %c0 = arith.constant 0 : index
    %c0_0 = arith.constant 0 : index
    %2 = vector.load %arg5[%c0, %c0_0] : memref<1x128xf32, #tpu.memory_space<vmem>>, vector<1x128xf32>
    %3 = vector.shape_cast %2 : vector<1x128xf32> to vector<1x128xf32>
    %4 = vector.broadcast %3 : vector<1x128xf32> to vector<256x128xf32>
    %c0_i32 = arith.constant 0 : i32
    %5 = arith.addi %1, %c0_i32 : i32
    %c0_1 = arith.constant 0 : index
    %c0_2 = arith.constant 0 : index
    %c0_3 = arith.constant 0 : index
    %6 = arith.index_cast %5 : i32 to index
    %c0_4 = arith.constant 0 : index
    %7 = vector.load %arg3[%c0_1, %c0_2, %c0_3, %6, %c0_4] : memref<1x1x1x834x8xbf16, #tpu.memory_space<vmem>>, vector<1x1x1x256x8xbf16>
    %8 = vector.shape_cast %7 : vector<1x1x1x256x8xbf16> to vector<256x8xbf16>
    %c0_5 = arith.constant 0 : index
    %c0_6 = arith.constant 0 : index
    %c0_7 = arith.constant 0 : index
    %9 = vector.load %arg4[%c0_5, %c0_6, %c0_7] : memref<9x8x128xbf16, #tpu.memory_space<vmem>>, vector<1x8x128xbf16>
    %10 = vector.shape_cast %9 : vector<1x8x128xbf16> to vector<8x128xbf16>
    %cst = arith.constant dense<0.000000e+00> : vector<256x128xf32>
    %11 = tpu.matmul %8, %10, %cst {dimension_numbers = #tpu.dot_dimension_numbers<[1], [0], [0], [1], [0, 0, 1, 1], [], []>} : vector<256x8xbf16>, vector<8x128xbf16>, vector<256x128xf32> -> vector<256x128xf32>
    %12 = arith.addf %4, %11 : vector<256x128xf32>
    %c1_i32 = arith.constant 1 : i32
    %13 = arith.addi %1, %c1_i32 : i32
    %c0_8 = arith.constant 0 : index
    %c0_9 = arith.constant 0 : index
    %c0_10 = arith.constant 0 : index
    %14 = arith.index_cast %13 : i32 to index
    %c0_11 = arith.constant 0 : index
    %15 = vector.load %arg3[%c0_8, %c0_9, %c0_10, %14, %c0_11] : memref<1x1x1x834x8xbf16, #tpu.memory_space<vmem>>, vector<1x1x1x256x8xbf16>
    %16 = vector.shape_cast %15 : vector<1x1x1x256x8xbf16> to vector<256x8xbf16>
    %c1 = arith.constant 1 : index
    %c0_12 = arith.constant 0 : index
    %c0_13 = arith.constant 0 : index
    %17 = vector.load %arg4[%c1, %c0_12, %c0_13] : memref<9x8x128xbf16, #tpu.memory_space<vmem>>, vector<1x8x128xbf16>
    %18 = vector.shape_cast %17 : vector<1x8x128xbf16> to vector<8x128xbf16>
    %cst_14 = arith.constant dense<0.000000e+00> : vector<256x128xf32>
    %19 = tpu.matmul %16, %18, %cst_14 {dimension_numbers = #tpu.dot_dimension_numbers<[1], [0], [0], [1], [0, 0, 1, 1], [], []>} : vector<256x8xbf16>, vector<8x128xbf16>, vector<256x128xf32> -> vector<256x128xf32>
    %20 = arith.addf %12, %19 : vector<256x128xf32>
    %c2_i32 = arith.constant 2 : i32
    %21 = arith.addi %1, %c2_i32 : i32
    %c0_15 = arith.constant 0 : index
    %c0_16 = arith.constant 0 : index
    %c0_17 = arith.constant 0 : index
    %22 = arith.index_cast %21 : i32 to index
    %c0_18 = arith.constant 0 : index
    %23 = vector.load %arg3[%c0_15, %c0_16, %c0_17, %22, %c0_18] : memref<1x1x1x834x8xbf16, #tpu.memory_space<vmem>>, vector<1x1x1x256x8xbf16>
    %24 = vector.shape_cast %23 : vector<1x1x1x256x8xbf16> to vector<256x8xbf16>
    %c2 = arith.constant 2 : index
    %c0_19 = arith.constant 0 : index
    %c0_20 = arith.constant 0 : index
    %25 = vector.load %arg4[%c2, %c0_19, %c0_20] : memref<9x8x128xbf16, #tpu.memory_space<vmem>>, vector<1x8x128xbf16>
    %26 = vector.shape_cast %25 : vector<1x8x128xbf16> to vector<8x128xbf16>
    %cst_21 = arith.constant dense<0.000000e+00> : vector<256x128xf32>
    %27 = tpu.matmul %24, %26, %cst_21 {dimension_numbers = #tpu.dot_dimension_numbers<[1], [0], [0], [1], [0, 0, 1, 1], [], []>} : vector<256x8xbf16>, vector<8x128xbf16>, vector<256x128xf32> -> vector<256x128xf32>
    %28 = arith.addf %20, %27 : vector<256x128xf32>
    %c32_i32 = arith.constant 32 : i32
    %29 = arith.addi %1, %c32_i32 : i32
    %c0_22 = arith.constant 0 : index
    %c0_23 = arith.constant 0 : index
    %c0_24 = arith.constant 0 : index
    %30 = arith.index_cast %29 : i32 to index
    %c0_25 = arith.constant 0 : index
    %31 = vector.load %arg3[%c0_22, %c0_23, %c0_24, %30, %c0_25] : memref<1x1x1x834x8xbf16, #tpu.memory_space<vmem>>, vector<1x1x1x256x8xbf16>
    %32 = vector.shape_cast %31 : vector<1x1x1x256x8xbf16> to vector<256x8xbf16>
    %c3 = arith.constant 3 : index
    %c0_26 = arith.constant 0 : index
    %c0_27 = arith.constant 0 : index
    %33 = vector.load %arg4[%c3, %c0_26, %c0_27] : memref<9x8x128xbf16, #tpu.memory_space<vmem>>, vector<1x8x128xbf16>
    %34 = vector.shape_cast %33 : vector<1x8x128xbf16> to vector<8x128xbf16>
    %cst_28 = arith.constant dense<0.000000e+00> : vector<256x128xf32>
    %35 = tpu.matmul %32, %34, %cst_28 {dimension_numbers = #tpu.dot_dimension_numbers<[1], [0], [0], [1], [0, 0, 1, 1], [], []>} : vector<256x8xbf16>, vector<8x128xbf16>, vector<256x128xf32> -> vector<256x128xf32>
    %36 = arith.addf %28, %35 : vector<256x128xf32>
    %c33_i32 = arith.constant 33 : i32
    %37 = arith.addi %1, %c33_i32 : i32
    %c0_29 = arith.constant 0 : index
    %c0_30 = arith.constant 0 : index
    %c0_31 = arith.constant 0 : index
    %38 = arith.index_cast %37 : i32 to index
    %c0_32 = arith.constant 0 : index
    %39 = vector.load %arg3[%c0_29, %c0_30, %c0_31, %38, %c0_32] : memref<1x1x1x834x8xbf16, #tpu.memory_space<vmem>>, vector<1x1x1x256x8xbf16>
    %40 = vector.shape_cast %39 : vector<1x1x1x256x8xbf16> to vector<256x8xbf16>
    %c4 = arith.constant 4 : index
    %c0_33 = arith.constant 0 : index
    %c0_34 = arith.constant 0 : index
    %41 = vector.load %arg4[%c4, %c0_33, %c0_34] : memref<9x8x128xbf16, #tpu.memory_space<vmem>>, vector<1x8x128xbf16>
    %42 = vector.shape_cast %41 : vector<1x8x128xbf16> to vector<8x128xbf16>
    %cst_35 = arith.constant dense<0.000000e+00> : vector<256x128xf32>
    %43 = tpu.matmul %40, %42, %cst_35 {dimension_numbers = #tpu.dot_dimension_numbers<[1], [0], [0], [1], [0, 0, 1, 1], [], []>} : vector<256x8xbf16>, vector<8x128xbf16>, vector<256x128xf32> -> vector<256x128xf32>
    %44 = arith.addf %36, %43 : vector<256x128xf32>
    %c34_i32 = arith.constant 34 : i32
    %45 = arith.addi %1, %c34_i32 : i32
    %c0_36 = arith.constant 0 : index
    %c0_37 = arith.constant 0 : index
    %c0_38 = arith.constant 0 : index
    %46 = arith.index_cast %45 : i32 to index
    %c0_39 = arith.constant 0 : index
    %47 = vector.load %arg3[%c0_36, %c0_37, %c0_38, %46, %c0_39] : memref<1x1x1x834x8xbf16, #tpu.memory_space<vmem>>, vector<1x1x1x256x8xbf16>
    %48 = vector.shape_cast %47 : vector<1x1x1x256x8xbf16> to vector<256x8xbf16>
    %c5 = arith.constant 5 : index
    %c0_40 = arith.constant 0 : index
    %c0_41 = arith.constant 0 : index
    %49 = vector.load %arg4[%c5, %c0_40, %c0_41] : memref<9x8x128xbf16, #tpu.memory_space<vmem>>, vector<1x8x128xbf16>
    %50 = vector.shape_cast %49 : vector<1x8x128xbf16> to vector<8x128xbf16>
    %cst_42 = arith.constant dense<0.000000e+00> : vector<256x128xf32>
    %51 = tpu.matmul %48, %50, %cst_42 {dimension_numbers = #tpu.dot_dimension_numbers<[1], [0], [0], [1], [0, 0, 1, 1], [], []>} : vector<256x8xbf16>, vector<8x128xbf16>, vector<256x128xf32> -> vector<256x128xf32>
    %52 = arith.addf %44, %51 : vector<256x128xf32>
    %c64_i32 = arith.constant 64 : i32
    %53 = arith.addi %1, %c64_i32 : i32
    %c0_43 = arith.constant 0 : index
    %c0_44 = arith.constant 0 : index
    %c0_45 = arith.constant 0 : index
    %54 = arith.index_cast %53 : i32 to index
    %c0_46 = arith.constant 0 : index
    %55 = vector.load %arg3[%c0_43, %c0_44, %c0_45, %54, %c0_46] : memref<1x1x1x834x8xbf16, #tpu.memory_space<vmem>>, vector<1x1x1x256x8xbf16>
    %56 = vector.shape_cast %55 : vector<1x1x1x256x8xbf16> to vector<256x8xbf16>
    %c6 = arith.constant 6 : index
    %c0_47 = arith.constant 0 : index
    %c0_48 = arith.constant 0 : index
    %57 = vector.load %arg4[%c6, %c0_47, %c0_48] : memref<9x8x128xbf16, #tpu.memory_space<vmem>>, vector<1x8x128xbf16>
    %58 = vector.shape_cast %57 : vector<1x8x128xbf16> to vector<8x128xbf16>
    %cst_49 = arith.constant dense<0.000000e+00> : vector<256x128xf32>
    %59 = tpu.matmul %56, %58, %cst_49 {dimension_numbers = #tpu.dot_dimension_numbers<[1], [0], [0], [1], [0, 0, 1, 1], [], []>} : vector<256x8xbf16>, vector<8x128xbf16>, vector<256x128xf32> -> vector<256x128xf32>
    %60 = arith.addf %52, %59 : vector<256x128xf32>
    %c65_i32 = arith.constant 65 : i32
    %61 = arith.addi %1, %c65_i32 : i32
    %c0_50 = arith.constant 0 : index
    %c0_51 = arith.constant 0 : index
    %c0_52 = arith.constant 0 : index
    %62 = arith.index_cast %61 : i32 to index
    %c0_53 = arith.constant 0 : index
    %63 = vector.load %arg3[%c0_50, %c0_51, %c0_52, %62, %c0_53] : memref<1x1x1x834x8xbf16, #tpu.memory_space<vmem>>, vector<1x1x1x256x8xbf16>
    %64 = vector.shape_cast %63 : vector<1x1x1x256x8xbf16> to vector<256x8xbf16>
    %c7 = arith.constant 7 : index
    %c0_54 = arith.constant 0 : index
    %c0_55 = arith.constant 0 : index
    %65 = vector.load %arg4[%c7, %c0_54, %c0_55] : memref<9x8x128xbf16, #tpu.memory_space<vmem>>, vector<1x8x128xbf16>
    %66 = vector.shape_cast %65 : vector<1x8x128xbf16> to vector<8x128xbf16>
    %cst_56 = arith.constant dense<0.000000e+00> : vector<256x128xf32>
    %67 = tpu.matmul %64, %66, %cst_56 {dimension_numbers = #tpu.dot_dimension_numbers<[1], [0], [0], [1], [0, 0, 1, 1], [], []>} : vector<256x8xbf16>, vector<8x128xbf16>, vector<256x128xf32> -> vector<256x128xf32>
    %68 = arith.addf %60, %67 : vector<256x128xf32>
    %c66_i32 = arith.constant 66 : i32
    %69 = arith.addi %1, %c66_i32 : i32
    %c0_57 = arith.constant 0 : index
    %c0_58 = arith.constant 0 : index
    %c0_59 = arith.constant 0 : index
    %70 = arith.index_cast %69 : i32 to index
    %c0_60 = arith.constant 0 : index
    %71 = vector.load %arg3[%c0_57, %c0_58, %c0_59, %70, %c0_60] : memref<1x1x1x834x8xbf16, #tpu.memory_space<vmem>>, vector<1x1x1x256x8xbf16>
    %72 = vector.shape_cast %71 : vector<1x1x1x256x8xbf16> to vector<256x8xbf16>
    %c8 = arith.constant 8 : index
    %c0_61 = arith.constant 0 : index
    %c0_62 = arith.constant 0 : index
    %73 = vector.load %arg4[%c8, %c0_61, %c0_62] : memref<9x8x128xbf16, #tpu.memory_space<vmem>>, vector<1x8x128xbf16>
    %74 = vector.shape_cast %73 : vector<1x8x128xbf16> to vector<8x128xbf16>
    %cst_63 = arith.constant dense<0.000000e+00> : vector<256x128xf32>
    %75 = tpu.matmul %72, %74, %cst_63 {dimension_numbers = #tpu.dot_dimension_numbers<[1], [0], [0], [1], [0, 0, 1, 1], [], []>} : vector<256x8xbf16>, vector<8x128xbf16>, vector<256x128xf32> -> vector<256x128xf32>
    %76 = arith.addf %68, %75 : vector<256x128xf32>
    %c0_64 = arith.constant 0 : index
    %c0_65 = arith.constant 0 : index
    %c0_66 = arith.constant 0 : index
    %77 = vector.load %arg6[%c0_64, %c0_65, %c0_66] : memref<1x256x128xf32, #tpu.memory_space<vmem>>, vector<1x256x128xf32>
    %78 = vector.shape_cast %77 : vector<1x256x128xf32> to vector<256x128xf32>
    %79 = vector.shape_cast %76 : vector<256x128xf32> to vector<1x256x128xf32>
    tpu.vector_store %arg6[%c0_64, %c0_65, %c0_66], %79 {strides = array<i32>} : memref<1x256x128xf32, #tpu.memory_space<vmem>>, vector<1x256x128xf32>,
    return
  }
  func.func @transform_0(%arg0: i32, %arg1: i32, %arg2: i32) -> (i32, i32, i32, i32, i32) {
    %c0_i32 = arith.constant 0 : i32
    %c0_i32_0 = arith.constant 0 : i32
    %c0_i32_1 = arith.constant 0 : i32
    %c0_i32_2 = arith.constant 0 : i32
    %c0_i32_3 = arith.constant 0 : i32
    return %arg0, %c0_i32, %c0_i32_0, %c0_i32_1, %c0_i32_2 : i32, i32, i32, i32, i32
  }
  func.func @transform_1(%arg0: i32, %arg1: i32, %arg2: i32) -> (i32, i32, i32) {
    %c0_i32 = arith.constant 0 : i32
    %c0_i32_0 = arith.constant 0 : i32
    %c0_i32_1 = arith.constant 0 : i32
    return %c0_i32, %c0_i32_0, %arg1 : i32, i32, i32
  }
  func.func @transform_2(%arg0: i32, %arg1: i32, %arg2: i32) -> (i32, i32) {
    %c0_i32 = arith.constant 0 : i32
    %c0_i32_0 = arith.constant 0 : i32
    return %c0_i32, %arg1 : i32, i32
  }
  func.func @transform_3(%arg0: i32, %arg1: i32, %arg2: i32) -> (i32, i32, i32) {
    %c0_i32 = arith.constant 0 : i32
    return %arg0, %arg2, %arg1 : i32, i32, i32
  }
}

module attributes {stable_mosaic.version = 11 : i64} {
  func.func @kernel(%arg0: i32, %arg1: i32, %arg2: i32, %arg3: memref<1x2x2x145x4xf32, #tpu.memory_space<vmem>>, %arg4: memref<9x4x128xbf16, #tpu.memory_space<vmem>>, %arg5: memref<1x128xf32, #tpu.memory_space<vmem>>, %arg6: memref<1x128x128xbf16, #tpu.memory_space<vmem>>) attributes {dimension_semantics = [#tpu.dimension_semantics<parallel>, #tpu.dimension_semantics<parallel>, #tpu.dimension_semantics<arbitrary>], iteration_bounds = array<i64: 2, 1, 1>, scalar_prefetch = 0 : i64, scratch_operands = 0 : i64, tpu.core_type = #tpu.core_type<tc>, window_params = [{transform_indices = @transform_0, window_bounds = array<i64: 1, 2, 2, 145, 4>}, {transform_indices = @transform_1, window_bounds = array<i64: 9, 4, 128>}, {transform_indices = @transform_2, window_bounds = array<i64: 1, 128>}, {transform_indices = @transform_3, window_bounds = array<i64: 1, 128, 128>}]} {
    %c128_i32 = arith.constant 128 : i32
    %0 = arith.muli %arg2, %c128_i32 : i32
    %1 = tpu.assume_multiple %0, 128 : i32
    %c0 = arith.constant 0 : index
    %c0_0 = arith.constant 0 : index
    %2 = vector.load %arg5[%c0, %c0_0] : memref<1x128xf32, #tpu.memory_space<vmem>>, vector<1x128xf32>
    %3 = vector.shape_cast %2 : vector<1x128xf32> to vector<1x128xf32>
    %4 = vector.broadcast %3 : vector<1x128xf32> to vector<128x128xf32>
    %c0_i32 = arith.constant 0 : i32
    %5 = arith.addi %1, %c0_i32 : i32
    %c0_1 = arith.constant 0 : index
    %c0_2 = arith.constant 0 : index
    %c0_3 = arith.constant 0 : index
    %6 = arith.index_cast %5 : i32 to index
    %c0_4 = arith.constant 0 : index
    %7 = vector.load %arg3[%c0_1, %c0_2, %c0_3, %6, %c0_4] : memref<1x2x2x145x4xf32, #tpu.memory_space<vmem>>, vector<1x1x1x128x4xf32>
    %8 = vector.shape_cast %7 : vector<1x1x1x128x4xf32> to vector<128x4xf32>
    %9 = arith.truncf %8 : vector<128x4xf32> to vector<128x4xbf16>
    %c0_5 = arith.constant 0 : index
    %c0_6 = arith.constant 0 : index
    %c0_7 = arith.constant 0 : index
    %10 = vector.load %arg4[%c0_5, %c0_6, %c0_7] : memref<9x4x128xbf16, #tpu.memory_space<vmem>>, vector<1x4x128xbf16>
    %11 = vector.shape_cast %10 : vector<1x4x128xbf16> to vector<4x128xbf16>
    %cst = arith.constant dense<0.000000e+00> : vector<128x128xf32>
    %12 = tpu.matmul %9, %11, %cst {dimension_numbers = #tpu.dot_dimension_numbers<[1], [0], [0], [1], [0, 0, 1, 1], [], []>} : vector<128x4xbf16>, vector<4x128xbf16>, vector<128x128xf32> -> vector<128x128xf32>
    %13 = arith.addf %4, %12 : vector<128x128xf32>
    %c0_i32_8 = arith.constant 0 : i32
    %14 = arith.addi %1, %c0_i32_8 : i32
    %c0_9 = arith.constant 0 : index
    %c0_10 = arith.constant 0 : index
    %c1 = arith.constant 1 : index
    %15 = arith.index_cast %14 : i32 to index
    %c0_11 = arith.constant 0 : index
    %16 = vector.load %arg3[%c0_9, %c0_10, %c1, %15, %c0_11] : memref<1x2x2x145x4xf32, #tpu.memory_space<vmem>>, vector<1x1x1x128x4xf32>
    %17 = vector.shape_cast %16 : vector<1x1x1x128x4xf32> to vector<128x4xf32>
    %18 = arith.truncf %17 : vector<128x4xf32> to vector<128x4xbf16>
    %c1_12 = arith.constant 1 : index
    %c0_13 = arith.constant 0 : index
    %c0_14 = arith.constant 0 : index
    %19 = vector.load %arg4[%c1_12, %c0_13, %c0_14] : memref<9x4x128xbf16, #tpu.memory_space<vmem>>, vector<1x4x128xbf16>
    %20 = vector.shape_cast %19 : vector<1x4x128xbf16> to vector<4x128xbf16>
    %cst_15 = arith.constant dense<0.000000e+00> : vector<128x128xf32>
    %21 = tpu.matmul %18, %20, %cst_15 {dimension_numbers = #tpu.dot_dimension_numbers<[1], [0], [0], [1], [0, 0, 1, 1], [], []>} : vector<128x4xbf16>, vector<4x128xbf16>, vector<128x128xf32> -> vector<128x128xf32>
    %22 = arith.addf %13, %21 : vector<128x128xf32>
    %c1_i32 = arith.constant 1 : i32
    %23 = arith.addi %1, %c1_i32 : i32
    %c0_16 = arith.constant 0 : index
    %c0_17 = arith.constant 0 : index
    %c0_18 = arith.constant 0 : index
    %24 = arith.index_cast %23 : i32 to index
    %c0_19 = arith.constant 0 : index
    %25 = vector.load %arg3[%c0_16, %c0_17, %c0_18, %24, %c0_19] : memref<1x2x2x145x4xf32, #tpu.memory_space<vmem>>, vector<1x1x1x128x4xf32>
    %26 = vector.shape_cast %25 : vector<1x1x1x128x4xf32> to vector<128x4xf32>
    %27 = arith.truncf %26 : vector<128x4xf32> to vector<128x4xbf16>
    %c2 = arith.constant 2 : index
    %c0_20 = arith.constant 0 : index
    %c0_21 = arith.constant 0 : index
    %28 = vector.load %arg4[%c2, %c0_20, %c0_21] : memref<9x4x128xbf16, #tpu.memory_space<vmem>>, vector<1x4x128xbf16>
    %29 = vector.shape_cast %28 : vector<1x4x128xbf16> to vector<4x128xbf16>
    %cst_22 = arith.constant dense<0.000000e+00> : vector<128x128xf32>
    %30 = tpu.matmul %27, %29, %cst_22 {dimension_numbers = #tpu.dot_dimension_numbers<[1], [0], [0], [1], [0, 0, 1, 1], [], []>} : vector<128x4xbf16>, vector<4x128xbf16>, vector<128x128xf32> -> vector<128x128xf32>
    %31 = arith.addf %22, %30 : vector<128x128xf32>
    %c0_i32_23 = arith.constant 0 : i32
    %32 = arith.addi %1, %c0_i32_23 : i32
    %c0_24 = arith.constant 0 : index
    %c1_25 = arith.constant 1 : index
    %c0_26 = arith.constant 0 : index
    %33 = arith.index_cast %32 : i32 to index
    %c0_27 = arith.constant 0 : index
    %34 = vector.load %arg3[%c0_24, %c1_25, %c0_26, %33, %c0_27] : memref<1x2x2x145x4xf32, #tpu.memory_space<vmem>>, vector<1x1x1x128x4xf32>
    %35 = vector.shape_cast %34 : vector<1x1x1x128x4xf32> to vector<128x4xf32>
    %36 = arith.truncf %35 : vector<128x4xf32> to vector<128x4xbf16>
    %c3 = arith.constant 3 : index
    %c0_28 = arith.constant 0 : index
    %c0_29 = arith.constant 0 : index
    %37 = vector.load %arg4[%c3, %c0_28, %c0_29] : memref<9x4x128xbf16, #tpu.memory_space<vmem>>, vector<1x4x128xbf16>
    %38 = vector.shape_cast %37 : vector<1x4x128xbf16> to vector<4x128xbf16>
    %cst_30 = arith.constant dense<0.000000e+00> : vector<128x128xf32>
    %39 = tpu.matmul %36, %38, %cst_30 {dimension_numbers = #tpu.dot_dimension_numbers<[1], [0], [0], [1], [0, 0, 1, 1], [], []>} : vector<128x4xbf16>, vector<4x128xbf16>, vector<128x128xf32> -> vector<128x128xf32>
    %40 = arith.addf %31, %39 : vector<128x128xf32>
    %c0_i32_31 = arith.constant 0 : i32
    %41 = arith.addi %1, %c0_i32_31 : i32
    %c0_32 = arith.constant 0 : index
    %c1_33 = arith.constant 1 : index
    %c1_34 = arith.constant 1 : index
    %42 = arith.index_cast %41 : i32 to index
    %c0_35 = arith.constant 0 : index
    %43 = vector.load %arg3[%c0_32, %c1_33, %c1_34, %42, %c0_35] : memref<1x2x2x145x4xf32, #tpu.memory_space<vmem>>, vector<1x1x1x128x4xf32>
    %44 = vector.shape_cast %43 : vector<1x1x1x128x4xf32> to vector<128x4xf32>
    %45 = arith.truncf %44 : vector<128x4xf32> to vector<128x4xbf16>
    %c4 = arith.constant 4 : index
    %c0_36 = arith.constant 0 : index
    %c0_37 = arith.constant 0 : index
    %46 = vector.load %arg4[%c4, %c0_36, %c0_37] : memref<9x4x128xbf16, #tpu.memory_space<vmem>>, vector<1x4x128xbf16>
    %47 = vector.shape_cast %46 : vector<1x4x128xbf16> to vector<4x128xbf16>
    %cst_38 = arith.constant dense<0.000000e+00> : vector<128x128xf32>
    %48 = tpu.matmul %45, %47, %cst_38 {dimension_numbers = #tpu.dot_dimension_numbers<[1], [0], [0], [1], [0, 0, 1, 1], [], []>} : vector<128x4xbf16>, vector<4x128xbf16>, vector<128x128xf32> -> vector<128x128xf32>
    %49 = arith.addf %40, %48 : vector<128x128xf32>
    %c1_i32_39 = arith.constant 1 : i32
    %50 = arith.addi %1, %c1_i32_39 : i32
    %c0_40 = arith.constant 0 : index
    %c1_41 = arith.constant 1 : index
    %c0_42 = arith.constant 0 : index
    %51 = arith.index_cast %50 : i32 to index
    %c0_43 = arith.constant 0 : index
    %52 = vector.load %arg3[%c0_40, %c1_41, %c0_42, %51, %c0_43] : memref<1x2x2x145x4xf32, #tpu.memory_space<vmem>>, vector<1x1x1x128x4xf32>
    %53 = vector.shape_cast %52 : vector<1x1x1x128x4xf32> to vector<128x4xf32>
    %54 = arith.truncf %53 : vector<128x4xf32> to vector<128x4xbf16>
    %c5 = arith.constant 5 : index
    %c0_44 = arith.constant 0 : index
    %c0_45 = arith.constant 0 : index
    %55 = vector.load %arg4[%c5, %c0_44, %c0_45] : memref<9x4x128xbf16, #tpu.memory_space<vmem>>, vector<1x4x128xbf16>
    %56 = vector.shape_cast %55 : vector<1x4x128xbf16> to vector<4x128xbf16>
    %cst_46 = arith.constant dense<0.000000e+00> : vector<128x128xf32>
    %57 = tpu.matmul %54, %56, %cst_46 {dimension_numbers = #tpu.dot_dimension_numbers<[1], [0], [0], [1], [0, 0, 1, 1], [], []>} : vector<128x4xbf16>, vector<4x128xbf16>, vector<128x128xf32> -> vector<128x128xf32>
    %58 = arith.addf %49, %57 : vector<128x128xf32>
    %c16_i32 = arith.constant 16 : i32
    %59 = arith.addi %1, %c16_i32 : i32
    %c0_47 = arith.constant 0 : index
    %c0_48 = arith.constant 0 : index
    %c0_49 = arith.constant 0 : index
    %60 = arith.index_cast %59 : i32 to index
    %c0_50 = arith.constant 0 : index
    %61 = vector.load %arg3[%c0_47, %c0_48, %c0_49, %60, %c0_50] : memref<1x2x2x145x4xf32, #tpu.memory_space<vmem>>, vector<1x1x1x128x4xf32>
    %62 = vector.shape_cast %61 : vector<1x1x1x128x4xf32> to vector<128x4xf32>
    %63 = arith.truncf %62 : vector<128x4xf32> to vector<128x4xbf16>
    %c6 = arith.constant 6 : index
    %c0_51 = arith.constant 0 : index
    %c0_52 = arith.constant 0 : index
    %64 = vector.load %arg4[%c6, %c0_51, %c0_52] : memref<9x4x128xbf16, #tpu.memory_space<vmem>>, vector<1x4x128xbf16>
    %65 = vector.shape_cast %64 : vector<1x4x128xbf16> to vector<4x128xbf16>
    %cst_53 = arith.constant dense<0.000000e+00> : vector<128x128xf32>
    %66 = tpu.matmul %63, %65, %cst_53 {dimension_numbers = #tpu.dot_dimension_numbers<[1], [0], [0], [1], [0, 0, 1, 1], [], []>} : vector<128x4xbf16>, vector<4x128xbf16>, vector<128x128xf32> -> vector<128x128xf32>
    %67 = arith.addf %58, %66 : vector<128x128xf32>
    %c16_i32_54 = arith.constant 16 : i32
    %68 = arith.addi %1, %c16_i32_54 : i32
    %c0_55 = arith.constant 0 : index
    %c0_56 = arith.constant 0 : index
    %c1_57 = arith.constant 1 : index
    %69 = arith.index_cast %68 : i32 to index
    %c0_58 = arith.constant 0 : index
    %70 = vector.load %arg3[%c0_55, %c0_56, %c1_57, %69, %c0_58] : memref<1x2x2x145x4xf32, #tpu.memory_space<vmem>>, vector<1x1x1x128x4xf32>
    %71 = vector.shape_cast %70 : vector<1x1x1x128x4xf32> to vector<128x4xf32>
    %72 = arith.truncf %71 : vector<128x4xf32> to vector<128x4xbf16>
    %c7 = arith.constant 7 : index
    %c0_59 = arith.constant 0 : index
    %c0_60 = arith.constant 0 : index
    %73 = vector.load %arg4[%c7, %c0_59, %c0_60] : memref<9x4x128xbf16, #tpu.memory_space<vmem>>, vector<1x4x128xbf16>
    %74 = vector.shape_cast %73 : vector<1x4x128xbf16> to vector<4x128xbf16>
    %cst_61 = arith.constant dense<0.000000e+00> : vector<128x128xf32>
    %75 = tpu.matmul %72, %74, %cst_61 {dimension_numbers = #tpu.dot_dimension_numbers<[1], [0], [0], [1], [0, 0, 1, 1], [], []>} : vector<128x4xbf16>, vector<4x128xbf16>, vector<128x128xf32> -> vector<128x128xf32>
    %76 = arith.addf %67, %75 : vector<128x128xf32>
    %c17_i32 = arith.constant 17 : i32
    %77 = arith.addi %1, %c17_i32 : i32
    %c0_62 = arith.constant 0 : index
    %c0_63 = arith.constant 0 : index
    %c0_64 = arith.constant 0 : index
    %78 = arith.index_cast %77 : i32 to index
    %c0_65 = arith.constant 0 : index
    %79 = vector.load %arg3[%c0_62, %c0_63, %c0_64, %78, %c0_65] : memref<1x2x2x145x4xf32, #tpu.memory_space<vmem>>, vector<1x1x1x128x4xf32>
    %80 = vector.shape_cast %79 : vector<1x1x1x128x4xf32> to vector<128x4xf32>
    %81 = arith.truncf %80 : vector<128x4xf32> to vector<128x4xbf16>
    %c8 = arith.constant 8 : index
    %c0_66 = arith.constant 0 : index
    %c0_67 = arith.constant 0 : index
    %82 = vector.load %arg4[%c8, %c0_66, %c0_67] : memref<9x4x128xbf16, #tpu.memory_space<vmem>>, vector<1x4x128xbf16>
    %83 = vector.shape_cast %82 : vector<1x4x128xbf16> to vector<4x128xbf16>
    %cst_68 = arith.constant dense<0.000000e+00> : vector<128x128xf32>
    %84 = tpu.matmul %81, %83, %cst_68 {dimension_numbers = #tpu.dot_dimension_numbers<[1], [0], [0], [1], [0, 0, 1, 1], [], []>} : vector<128x4xbf16>, vector<4x128xbf16>, vector<128x128xf32> -> vector<128x128xf32>
    %85 = arith.addf %76, %84 : vector<128x128xf32>
    %cst_69 = arith.constant 0.000000e+00 : f32
    %86 = vector.broadcast %cst_69 : f32 to vector<128x128xf32>
    %87 = arith.maximumf %85, %86 : vector<128x128xf32>
    %88 = arith.truncf %87 : vector<128x128xf32> to vector<128x128xbf16>
    %c0_70 = arith.constant 0 : index
    %c0_71 = arith.constant 0 : index
    %c0_72 = arith.constant 0 : index
    %89 = vector.load %arg6[%c0_70, %c0_71, %c0_72] : memref<1x128x128xbf16, #tpu.memory_space<vmem>>, vector<1x128x128xbf16>
    %90 = vector.shape_cast %89 : vector<1x128x128xbf16> to vector<128x128xbf16>
    %91 = vector.shape_cast %88 : vector<128x128xbf16> to vector<1x128x128xbf16>
    tpu.vector_store %arg6[%c0_70, %c0_71, %c0_72], %91 {strides = array<i32>} : memref<1x128x128xbf16, #tpu.memory_space<vmem>>, vector<1x128x128xbf16>,
    return
  }
  func.func @transform_0(%arg0: i32, %arg1: i32, %arg2: i32) -> (i32, i32, i32, i32, i32) {
    %c0_i32 = arith.constant 0 : i32
    %c0_i32_0 = arith.constant 0 : i32
    %c0_i32_1 = arith.constant 0 : i32
    %c0_i32_2 = arith.constant 0 : i32
    %c0_i32_3 = arith.constant 0 : i32
    return %arg0, %c0_i32, %c0_i32_0, %c0_i32_1, %c0_i32_2 : i32, i32, i32, i32, i32
  }
  func.func @transform_1(%arg0: i32, %arg1: i32, %arg2: i32) -> (i32, i32, i32) {
    %c0_i32 = arith.constant 0 : i32
    %c0_i32_0 = arith.constant 0 : i32
    %c0_i32_1 = arith.constant 0 : i32
    return %c0_i32, %c0_i32_0, %arg1 : i32, i32, i32
  }
  func.func @transform_2(%arg0: i32, %arg1: i32, %arg2: i32) -> (i32, i32) {
    %c0_i32 = arith.constant 0 : i32
    %c0_i32_0 = arith.constant 0 : i32
    return %c0_i32, %arg1 : i32, i32
  }
  func.func @transform_3(%arg0: i32, %arg1: i32, %arg2: i32) -> (i32, i32, i32) {
    %c0_i32 = arith.constant 0 : i32
    return %arg0, %arg2, %arg1 : i32, i32, i32
  }
}

module attributes {stable_mosaic.version = 11 : i64} {
  func.func @kernel(%arg0: i32, %arg1: i32, %arg2: i32, %arg3: memref<1x1x1x162x8xf32, #tpu.memory_space<vmem>>, %arg4: memref<9x8x128xbf16, #tpu.memory_space<vmem>>, %arg5: memref<1x128xf32, #tpu.memory_space<vmem>>, %arg6: memref<1x128x4xbf16, #tpu.memory_space<vmem>>, %arg7: memref<4x128xbf16, #tpu.memory_space<vmem>>, %arg8: memref<1x128x128xf32, #tpu.memory_space<vmem>>) attributes {dimension_semantics = [#tpu.dimension_semantics<parallel>, #tpu.dimension_semantics<parallel>, #tpu.dimension_semantics<arbitrary>], iteration_bounds = array<i64: 2, 1, 1>, scalar_prefetch = 0 : i64, scratch_operands = 0 : i64, tpu.core_type = #tpu.core_type<tc>, window_params = [{transform_indices = @transform_0, window_bounds = array<i64: 1, 1, 1, 162, 8>}, {transform_indices = @transform_1, window_bounds = array<i64: 9, 8, 128>}, {transform_indices = @transform_2, window_bounds = array<i64: 1, 128>}, {transform_indices = @transform_3, window_bounds = array<i64: 1, 128, 4>}, {transform_indices = @transform_4, window_bounds = array<i64: 4, 128>}, {transform_indices = @transform_5, window_bounds = array<i64: 1, 128, 128>}]} {
    %c128_i32 = arith.constant 128 : i32
    %0 = arith.muli %arg2, %c128_i32 : i32
    %1 = tpu.assume_multiple %0, 128 : i32
    %c0 = arith.constant 0 : index
    %c0_0 = arith.constant 0 : index
    %2 = vector.load %arg5[%c0, %c0_0] : memref<1x128xf32, #tpu.memory_space<vmem>>, vector<1x128xf32>
    %3 = vector.shape_cast %2 : vector<1x128xf32> to vector<1x128xf32>
    %4 = vector.broadcast %3 : vector<1x128xf32> to vector<128x128xf32>
    %c0_i32 = arith.constant 0 : i32
    %5 = arith.addi %1, %c0_i32 : i32
    %c0_1 = arith.constant 0 : index
    %c0_2 = arith.constant 0 : index
    %c0_3 = arith.constant 0 : index
    %6 = arith.index_cast %5 : i32 to index
    %c0_4 = arith.constant 0 : index
    %7 = vector.load %arg3[%c0_1, %c0_2, %c0_3, %6, %c0_4] : memref<1x1x1x162x8xf32, #tpu.memory_space<vmem>>, vector<1x1x1x128x8xf32>
    %8 = vector.shape_cast %7 : vector<1x1x1x128x8xf32> to vector<128x8xf32>
    %9 = arith.truncf %8 : vector<128x8xf32> to vector<128x8xbf16>
    %c0_5 = arith.constant 0 : index
    %c0_6 = arith.constant 0 : index
    %c0_7 = arith.constant 0 : index
    %10 = vector.load %arg4[%c0_5, %c0_6, %c0_7] : memref<9x8x128xbf16, #tpu.memory_space<vmem>>, vector<1x8x128xbf16>
    %11 = vector.shape_cast %10 : vector<1x8x128xbf16> to vector<8x128xbf16>
    %cst = arith.constant dense<0.000000e+00> : vector<128x128xf32>
    %12 = tpu.matmul %9, %11, %cst {dimension_numbers = #tpu.dot_dimension_numbers<[1], [0], [0], [1], [0, 0, 1, 1], [], []>} : vector<128x8xbf16>, vector<8x128xbf16>, vector<128x128xf32> -> vector<128x128xf32>
    %13 = arith.addf %4, %12 : vector<128x128xf32>
    %c1_i32 = arith.constant 1 : i32
    %14 = arith.addi %1, %c1_i32 : i32
    %c0_8 = arith.constant 0 : index
    %c0_9 = arith.constant 0 : index
    %c0_10 = arith.constant 0 : index
    %15 = arith.index_cast %14 : i32 to index
    %c0_11 = arith.constant 0 : index
    %16 = vector.load %arg3[%c0_8, %c0_9, %c0_10, %15, %c0_11] : memref<1x1x1x162x8xf32, #tpu.memory_space<vmem>>, vector<1x1x1x128x8xf32>
    %17 = vector.shape_cast %16 : vector<1x1x1x128x8xf32> to vector<128x8xf32>
    %18 = arith.truncf %17 : vector<128x8xf32> to vector<128x8xbf16>
    %c1 = arith.constant 1 : index
    %c0_12 = arith.constant 0 : index
    %c0_13 = arith.constant 0 : index
    %19 = vector.load %arg4[%c1, %c0_12, %c0_13] : memref<9x8x128xbf16, #tpu.memory_space<vmem>>, vector<1x8x128xbf16>
    %20 = vector.shape_cast %19 : vector<1x8x128xbf16> to vector<8x128xbf16>
    %cst_14 = arith.constant dense<0.000000e+00> : vector<128x128xf32>
    %21 = tpu.matmul %18, %20, %cst_14 {dimension_numbers = #tpu.dot_dimension_numbers<[1], [0], [0], [1], [0, 0, 1, 1], [], []>} : vector<128x8xbf16>, vector<8x128xbf16>, vector<128x128xf32> -> vector<128x128xf32>
    %22 = arith.addf %13, %21 : vector<128x128xf32>
    %c2_i32 = arith.constant 2 : i32
    %23 = arith.addi %1, %c2_i32 : i32
    %c0_15 = arith.constant 0 : index
    %c0_16 = arith.constant 0 : index
    %c0_17 = arith.constant 0 : index
    %24 = arith.index_cast %23 : i32 to index
    %c0_18 = arith.constant 0 : index
    %25 = vector.load %arg3[%c0_15, %c0_16, %c0_17, %24, %c0_18] : memref<1x1x1x162x8xf32, #tpu.memory_space<vmem>>, vector<1x1x1x128x8xf32>
    %26 = vector.shape_cast %25 : vector<1x1x1x128x8xf32> to vector<128x8xf32>
    %27 = arith.truncf %26 : vector<128x8xf32> to vector<128x8xbf16>
    %c2 = arith.constant 2 : index
    %c0_19 = arith.constant 0 : index
    %c0_20 = arith.constant 0 : index
    %28 = vector.load %arg4[%c2, %c0_19, %c0_20] : memref<9x8x128xbf16, #tpu.memory_space<vmem>>, vector<1x8x128xbf16>
    %29 = vector.shape_cast %28 : vector<1x8x128xbf16> to vector<8x128xbf16>
    %cst_21 = arith.constant dense<0.000000e+00> : vector<128x128xf32>
    %30 = tpu.matmul %27, %29, %cst_21 {dimension_numbers = #tpu.dot_dimension_numbers<[1], [0], [0], [1], [0, 0, 1, 1], [], []>} : vector<128x8xbf16>, vector<8x128xbf16>, vector<128x128xf32> -> vector<128x128xf32>
    %31 = arith.addf %22, %30 : vector<128x128xf32>
    %c16_i32 = arith.constant 16 : i32
    %32 = arith.addi %1, %c16_i32 : i32
    %c0_22 = arith.constant 0 : index
    %c0_23 = arith.constant 0 : index
    %c0_24 = arith.constant 0 : index
    %33 = arith.index_cast %32 : i32 to index
    %c0_25 = arith.constant 0 : index
    %34 = vector.load %arg3[%c0_22, %c0_23, %c0_24, %33, %c0_25] : memref<1x1x1x162x8xf32, #tpu.memory_space<vmem>>, vector<1x1x1x128x8xf32>
    %35 = vector.shape_cast %34 : vector<1x1x1x128x8xf32> to vector<128x8xf32>
    %36 = arith.truncf %35 : vector<128x8xf32> to vector<128x8xbf16>
    %c3 = arith.constant 3 : index
    %c0_26 = arith.constant 0 : index
    %c0_27 = arith.constant 0 : index
    %37 = vector.load %arg4[%c3, %c0_26, %c0_27] : memref<9x8x128xbf16, #tpu.memory_space<vmem>>, vector<1x8x128xbf16>
    %38 = vector.shape_cast %37 : vector<1x8x128xbf16> to vector<8x128xbf16>
    %cst_28 = arith.constant dense<0.000000e+00> : vector<128x128xf32>
    %39 = tpu.matmul %36, %38, %cst_28 {dimension_numbers = #tpu.dot_dimension_numbers<[1], [0], [0], [1], [0, 0, 1, 1], [], []>} : vector<128x8xbf16>, vector<8x128xbf16>, vector<128x128xf32> -> vector<128x128xf32>
    %40 = arith.addf %31, %39 : vector<128x128xf32>
    %c17_i32 = arith.constant 17 : i32
    %41 = arith.addi %1, %c17_i32 : i32
    %c0_29 = arith.constant 0 : index
    %c0_30 = arith.constant 0 : index
    %c0_31 = arith.constant 0 : index
    %42 = arith.index_cast %41 : i32 to index
    %c0_32 = arith.constant 0 : index
    %43 = vector.load %arg3[%c0_29, %c0_30, %c0_31, %42, %c0_32] : memref<1x1x1x162x8xf32, #tpu.memory_space<vmem>>, vector<1x1x1x128x8xf32>
    %44 = vector.shape_cast %43 : vector<1x1x1x128x8xf32> to vector<128x8xf32>
    %45 = arith.truncf %44 : vector<128x8xf32> to vector<128x8xbf16>
    %c4 = arith.constant 4 : index
    %c0_33 = arith.constant 0 : index
    %c0_34 = arith.constant 0 : index
    %46 = vector.load %arg4[%c4, %c0_33, %c0_34] : memref<9x8x128xbf16, #tpu.memory_space<vmem>>, vector<1x8x128xbf16>
    %47 = vector.shape_cast %46 : vector<1x8x128xbf16> to vector<8x128xbf16>
    %cst_35 = arith.constant dense<0.000000e+00> : vector<128x128xf32>
    %48 = tpu.matmul %45, %47, %cst_35 {dimension_numbers = #tpu.dot_dimension_numbers<[1], [0], [0], [1], [0, 0, 1, 1], [], []>} : vector<128x8xbf16>, vector<8x128xbf16>, vector<128x128xf32> -> vector<128x128xf32>
    %49 = arith.addf %40, %48 : vector<128x128xf32>
    %c18_i32 = arith.constant 18 : i32
    %50 = arith.addi %1, %c18_i32 : i32
    %c0_36 = arith.constant 0 : index
    %c0_37 = arith.constant 0 : index
    %c0_38 = arith.constant 0 : index
    %51 = arith.index_cast %50 : i32 to index
    %c0_39 = arith.constant 0 : index
    %52 = vector.load %arg3[%c0_36, %c0_37, %c0_38, %51, %c0_39] : memref<1x1x1x162x8xf32, #tpu.memory_space<vmem>>, vector<1x1x1x128x8xf32>
    %53 = vector.shape_cast %52 : vector<1x1x1x128x8xf32> to vector<128x8xf32>
    %54 = arith.truncf %53 : vector<128x8xf32> to vector<128x8xbf16>
    %c5 = arith.constant 5 : index
    %c0_40 = arith.constant 0 : index
    %c0_41 = arith.constant 0 : index
    %55 = vector.load %arg4[%c5, %c0_40, %c0_41] : memref<9x8x128xbf16, #tpu.memory_space<vmem>>, vector<1x8x128xbf16>
    %56 = vector.shape_cast %55 : vector<1x8x128xbf16> to vector<8x128xbf16>
    %cst_42 = arith.constant dense<0.000000e+00> : vector<128x128xf32>
    %57 = tpu.matmul %54, %56, %cst_42 {dimension_numbers = #tpu.dot_dimension_numbers<[1], [0], [0], [1], [0, 0, 1, 1], [], []>} : vector<128x8xbf16>, vector<8x128xbf16>, vector<128x128xf32> -> vector<128x128xf32>
    %58 = arith.addf %49, %57 : vector<128x128xf32>
    %c32_i32 = arith.constant 32 : i32
    %59 = arith.addi %1, %c32_i32 : i32
    %c0_43 = arith.constant 0 : index
    %c0_44 = arith.constant 0 : index
    %c0_45 = arith.constant 0 : index
    %60 = arith.index_cast %59 : i32 to index
    %c0_46 = arith.constant 0 : index
    %61 = vector.load %arg3[%c0_43, %c0_44, %c0_45, %60, %c0_46] : memref<1x1x1x162x8xf32, #tpu.memory_space<vmem>>, vector<1x1x1x128x8xf32>
    %62 = vector.shape_cast %61 : vector<1x1x1x128x8xf32> to vector<128x8xf32>
    %63 = arith.truncf %62 : vector<128x8xf32> to vector<128x8xbf16>
    %c6 = arith.constant 6 : index
    %c0_47 = arith.constant 0 : index
    %c0_48 = arith.constant 0 : index
    %64 = vector.load %arg4[%c6, %c0_47, %c0_48] : memref<9x8x128xbf16, #tpu.memory_space<vmem>>, vector<1x8x128xbf16>
    %65 = vector.shape_cast %64 : vector<1x8x128xbf16> to vector<8x128xbf16>
    %cst_49 = arith.constant dense<0.000000e+00> : vector<128x128xf32>
    %66 = tpu.matmul %63, %65, %cst_49 {dimension_numbers = #tpu.dot_dimension_numbers<[1], [0], [0], [1], [0, 0, 1, 1], [], []>} : vector<128x8xbf16>, vector<8x128xbf16>, vector<128x128xf32> -> vector<128x128xf32>
    %67 = arith.addf %58, %66 : vector<128x128xf32>
    %c33_i32 = arith.constant 33 : i32
    %68 = arith.addi %1, %c33_i32 : i32
    %c0_50 = arith.constant 0 : index
    %c0_51 = arith.constant 0 : index
    %c0_52 = arith.constant 0 : index
    %69 = arith.index_cast %68 : i32 to index
    %c0_53 = arith.constant 0 : index
    %70 = vector.load %arg3[%c0_50, %c0_51, %c0_52, %69, %c0_53] : memref<1x1x1x162x8xf32, #tpu.memory_space<vmem>>, vector<1x1x1x128x8xf32>
    %71 = vector.shape_cast %70 : vector<1x1x1x128x8xf32> to vector<128x8xf32>
    %72 = arith.truncf %71 : vector<128x8xf32> to vector<128x8xbf16>
    %c7 = arith.constant 7 : index
    %c0_54 = arith.constant 0 : index
    %c0_55 = arith.constant 0 : index
    %73 = vector.load %arg4[%c7, %c0_54, %c0_55] : memref<9x8x128xbf16, #tpu.memory_space<vmem>>, vector<1x8x128xbf16>
    %74 = vector.shape_cast %73 : vector<1x8x128xbf16> to vector<8x128xbf16>
    %cst_56 = arith.constant dense<0.000000e+00> : vector<128x128xf32>
    %75 = tpu.matmul %72, %74, %cst_56 {dimension_numbers = #tpu.dot_dimension_numbers<[1], [0], [0], [1], [0, 0, 1, 1], [], []>} : vector<128x8xbf16>, vector<8x128xbf16>, vector<128x128xf32> -> vector<128x128xf32>
    %76 = arith.addf %67, %75 : vector<128x128xf32>
    %c34_i32 = arith.constant 34 : i32
    %77 = arith.addi %1, %c34_i32 : i32
    %c0_57 = arith.constant 0 : index
    %c0_58 = arith.constant 0 : index
    %c0_59 = arith.constant 0 : index
    %78 = arith.index_cast %77 : i32 to index
    %c0_60 = arith.constant 0 : index
    %79 = vector.load %arg3[%c0_57, %c0_58, %c0_59, %78, %c0_60] : memref<1x1x1x162x8xf32, #tpu.memory_space<vmem>>, vector<1x1x1x128x8xf32>
    %80 = vector.shape_cast %79 : vector<1x1x1x128x8xf32> to vector<128x8xf32>
    %81 = arith.truncf %80 : vector<128x8xf32> to vector<128x8xbf16>
    %c8 = arith.constant 8 : index
    %c0_61 = arith.constant 0 : index
    %c0_62 = arith.constant 0 : index
    %82 = vector.load %arg4[%c8, %c0_61, %c0_62] : memref<9x8x128xbf16, #tpu.memory_space<vmem>>, vector<1x8x128xbf16>
    %83 = vector.shape_cast %82 : vector<1x8x128xbf16> to vector<8x128xbf16>
    %cst_63 = arith.constant dense<0.000000e+00> : vector<128x128xf32>
    %84 = tpu.matmul %81, %83, %cst_63 {dimension_numbers = #tpu.dot_dimension_numbers<[1], [0], [0], [1], [0, 0, 1, 1], [], []>} : vector<128x8xbf16>, vector<8x128xbf16>, vector<128x128xf32> -> vector<128x128xf32>
    %85 = arith.addf %76, %84 : vector<128x128xf32>
    %c0_64 = arith.constant 0 : index
    %c0_65 = arith.constant 0 : index
    %c0_66 = arith.constant 0 : index
    %86 = vector.load %arg6[%c0_64, %c0_65, %c0_66] : memref<1x128x4xbf16, #tpu.memory_space<vmem>>, vector<1x128x4xbf16>
    %87 = vector.shape_cast %86 : vector<1x128x4xbf16> to vector<128x4xbf16>
    %c0_67 = arith.constant 0 : index
    %c0_68 = arith.constant 0 : index
    %88 = vector.load %arg7[%c0_67, %c0_68] : memref<4x128xbf16, #tpu.memory_space<vmem>>, vector<4x128xbf16>
    %cst_69 = arith.constant dense<0.000000e+00> : vector<128x128xf32>
    %89 = tpu.matmul %87, %88, %cst_69 {dimension_numbers = #tpu.dot_dimension_numbers<[1], [0], [0], [1], [0, 0, 1, 1], [], []>} : vector<128x4xbf16>, vector<4x128xbf16>, vector<128x128xf32> -> vector<128x128xf32>
    %90 = arith.addf %85, %89 : vector<128x128xf32>
    %cst_70 = arith.constant 0.000000e+00 : f32
    %91 = vector.broadcast %cst_70 : f32 to vector<128x128xf32>
    %92 = arith.maximumf %90, %91 : vector<128x128xf32>
    %c0_71 = arith.constant 0 : index
    %c0_72 = arith.constant 0 : index
    %c0_73 = arith.constant 0 : index
    %93 = vector.load %arg8[%c0_71, %c0_72, %c0_73] : memref<1x128x128xf32, #tpu.memory_space<vmem>>, vector<1x128x128xf32>
    %94 = vector.shape_cast %93 : vector<1x128x128xf32> to vector<128x128xf32>
    %95 = vector.shape_cast %92 : vector<128x128xf32> to vector<1x128x128xf32>
    tpu.vector_store %arg8[%c0_71, %c0_72, %c0_73], %95 {strides = array<i32>} : memref<1x128x128xf32, #tpu.memory_space<vmem>>, vector<1x128x128xf32>,
    return
  }
  func.func @transform_0(%arg0: i32, %arg1: i32, %arg2: i32) -> (i32, i32, i32, i32, i32) {
    %c0_i32 = arith.constant 0 : i32
    %c0_i32_0 = arith.constant 0 : i32
    %c0_i32_1 = arith.constant 0 : i32
    %c0_i32_2 = arith.constant 0 : i32
    %c0_i32_3 = arith.constant 0 : i32
    return %arg0, %c0_i32, %c0_i32_0, %c0_i32_1, %c0_i32_2 : i32, i32, i32, i32, i32
  }
  func.func @transform_1(%arg0: i32, %arg1: i32, %arg2: i32) -> (i32, i32, i32) {
    %c0_i32 = arith.constant 0 : i32
    %c0_i32_0 = arith.constant 0 : i32
    %c0_i32_1 = arith.constant 0 : i32
    return %c0_i32, %c0_i32_0, %arg1 : i32, i32, i32
  }
  func.func @transform_2(%arg0: i32, %arg1: i32, %arg2: i32) -> (i32, i32) {
    %c0_i32 = arith.constant 0 : i32
    %c0_i32_0 = arith.constant 0 : i32
    return %c0_i32, %arg1 : i32, i32
  }
  func.func @transform_3(%arg0: i32, %arg1: i32, %arg2: i32) -> (i32, i32, i32) {
    %c0_i32 = arith.constant 0 : i32
    %c0_i32_0 = arith.constant 0 : i32
    return %arg0, %arg2, %c0_i32 : i32, i32, i32
  }
  func.func @transform_4(%arg0: i32, %arg1: i32, %arg2: i32) -> (i32, i32) {
    %c0_i32 = arith.constant 0 : i32
    %c0_i32_0 = arith.constant 0 : i32
    return %c0_i32, %arg1 : i32, i32
  }
  func.func @transform_5(%arg0: i32, %arg1: i32, %arg2: i32) -> (i32, i32, i32) {
    %c0_i32 = arith.constant 0 : i32
    return %arg0, %arg2, %arg1 : i32, i32, i32
  }
}

</mosaic_0001>

<bundles_post_ra>
// kernel: basic_block_forward.2
= control target key start
LH: loop header
LB: loop body
LE: loop exit
PB: predicated region body
PF: predicated region fallthrough
CT: control target
= control target key end

     0   :  { %s2773_s12 = smov 0   ;;  %s2775_s13 = smov 0   ;;  %s3156_s0 = inlined_call_operand.vmem [shape: f32[2,2,2,145,4], index: 0, kind: input, shape index: {}]   ;;  %s3157_s1 = inlined_call_operand.vmem [shape: bf16[9,4,128], index: 1, kind: input, shape index: {}]   ;;  %s3158_s2 = inlined_call_operand.vmem [shape: f32[1,128], index: 2, kind: input, shape index: {}]   ;;  %s3159_s3 = inlined_call_operand.vmem [shape: bf16[2,128,128], index: 3, kind: output, shape index: {}]  }
   0x1   :  { %s2777_s14 = smov 0  }
   0x2 LB: > { %s32_s15 = sadd.s32 1, %s2747_s13  ;;  %p2010_p0 = scmp.ge.s32.totalorder %s2751_s14, 1  ;;  %s2751_s14 = sphi %s2777_s14, %s13_s14   ;;  %s2747_s13 = sphi %s2775_s13, %s3161_s13   ;;  %s2743_s12 = sphi %s2773_s12, %s3160_s12  }
   0x3   : > { %p34_p1 = scmp.ge.s32.totalorder %s32_s15, 2  ;;  %p177_p2 = scmp.lt.s32.totalorder %s2751_s14, 3 }
   0x5   : > { %s3163_s15 = smov (%p34_p1, %s32_s15), 0  ;;  %p178_p3 = pnand %p2010_p0, %p177_p2 }
   0x6   : > { %v274_v0 = vld [vmem:[%s3157_s1] sm:$0x3] (!%p178_p3)  ;;  %vm300_vm0 = vcmask (!%p178_p3), 1041408   ;;  %v2797_v1 = vld [vmem:[%s3157_s1 + $0x8] sm:$0x3] (!%p178_p3)  ;;  %p215_p4 = scmp.lt.s32.totalorder (!%p178_p3), %s2743_s12, 1 }
   0x7   : > { %181 = sbr.rel (%p178_p3) target bundleno = 382 (0x17e), region = 32  ;;  %2694 = vmatprep.subr.msk.bf16.mxu1 (!%p178_p3), %vm300_vm0, %v274_v0  ;;  %v302_v2 = vsel (!%p178_p3), %vm300_vm0, %v274_v0, 0  ;;  %2698 = vmatprep.subr.msk.bf16.mxu0 (!%p178_p3), %vm300_vm0, %v2797_v1  ;;  %v2805_v3 = vsel (!%p178_p3), %vm300_vm0, %v2797_v1, 0  ;;  %v2039_v4 = vld [vmem:[%s3157_s1 + $0x2] sm:$0x3] (!%p178_p3)  ;;  %vm275_vm1 = vcmask (!%p178_p3), 31744  }
   0x8   : > { %2387 = vmatpush3.bf16.msra.mxu1 (!%p178_p3), %v302_v2  ;;  %2459 = vmatpush3.bf16.msra.mxu0 (!%p178_p3), %v2805_v3  ;;  %v2139_v5 = vld [vmem:[%s3157_s1 + $0xa] sm:$0x3] (!%p178_p3)  ;;  %v470_v15 = vsel (!%p178_p3), %vm300_vm0, %v2039_v4, 0  ;;  %v2164_v26 = vld [vmem:[%s3157_s1 + $0xc] sm:$0x3] (!%p178_p3) }
   0x9   : > { %2695 = vmatprep.subr.msk.bf16.mxu1 (!%p178_p3), %vm300_vm0, %v2039_v4  ;;  %2700 = vmatprep.subr.msk.bf16.mxu0 (!%p178_p3), %vm300_vm0, %v2139_v5  ;;  %v1142_v20 = vsel (!%p178_p3), %vm300_vm0, %v2139_v5, 0  ;;  %v2852_v27 = vld [vmem:[%s3157_s1 + $0x4] sm:$0x3] (!%p178_p3)  ;;  %v1310_v52 = vsel (!%p178_p3), %vm300_vm0, %v2164_v26, 0  ;;  %v2189_v53 = vld [vmem:[%s3157_s1 + $0xe] sm:$0x3] (!%p178_p3) }
   0xe   : > { %s3165_s12 = smov (!%p215_p4, %s2743_s12), 1 }
   0xf   : > { %s2704_s24 = smul.u32 608, %s3165_s12  ;;  %s2241_s17 = sshll.u32 %s3165_s12, 6 }
  0x10   : > { %s3125_s20 = scalar_lea.vmem %s3159_s3, %s2241_s17 }
  0x11   : > { %s2822_s27 = scalar_lea.vmem %s3156_s0, %s2704_s24 }
  0x12   : > { %v250_v6 = vld [vmem:[%s2822_s27] sm:$0xff]  ;;  %v251_v7 = vld [vmem:[%s2822_s27 + $0x8] sm:$0xff]  ;;  %v2099_v10 = vld [vmem:[%s2822_s27 + $0x1d0] sm:$0xff] }
  0x13   : > { %v2098_v8 = vld [vmem:[%s2822_s27 + $0x1c8] sm:$0xff]  ;;  %v266_v9 = vpack.c.bf16 %v251_v7, %v250_v6  ;;  %v252_v11 = vld [vmem:[%s2822_s27 + $0x10] sm:$0xff]  ;;  %v253_v12 = vld [vmem:[%s2822_s27 + $0x18] sm:$0xff] }
  0x14   : > { %v939_v13 = vpack.c.bf16 %v2099_v10, %v2098_v8  ;;  %v2830_v14 = vpack.c.bf16 %v253_v12, %v252_v11  ;;  %v2100_v16 = vld [vmem:[%s2822_s27 + $0x1d8] sm:$0xff]  ;;  %v2101_v17 = vld [vmem:[%s2822_s27 + $0x1e0] sm:$0xff]  ;;  %v255_v21 = vld [vmem:[%s2822_s27 + $0x28] sm:$0xff] }
  0x15   : > { %v254_v18 = vld [vmem:[%s2822_s27 + $0x20] sm:$0xff]  ;;  %2388 = vmatprep.mubr.msk.bf16.mxu1 %vm275_vm1, %v266_v9  ;;  %v940_v19 = vpack.c.bf16 %v2101_v17, %v2100_v16  ;;  %v2102_v22 = vld [vmem:[%s2822_s27 + $0x1e8] sm:$0xff]  ;;  %v2103_v23 = vld [vmem:[%s2822_s27 + $0x1f0] sm:$0xff] }
  0x16   : > { %2460 = vmatprep.mubr.msk.bf16.mxu0 %vm275_vm1, %v939_v13  ;;  %2389 = vmatmul.mubr.msk.bf16.vlgmr.msra.gmra.mrb[0].mxu1 %vm275_vm1, %v2830_v14  ;;  %v2844_v24 = vpack.c.bf16 %v255_v21, %v254_v18  ;;  %v941_v25 = vpack.c.bf16 %v2103_v23, %v2102_v22  ;;  %v256_v28 = vld [vmem:[%s2822_s27 + $0x30] sm:$0xff]  ;;  %v257_v29 = vld [vmem:[%s2822_s27 + $0x38] sm:$0xff]  ;;  %v2105_v31 = vld [vmem:[%s2822_s27 + $0x200] sm:$0xff] }
  0x17   : > { %2405 = vmatpush3.bf16.msra.mxu1 %v470_v15  ;;  %2461 = vmatmul.mubr.msk.bf16.vlgmr.msra.gmra.mrb[0].mxu0 %vm275_vm1, %v940_v19  ;;  %v2104_v30 = vld [vmem:[%s2822_s27 + $0x1f8] sm:$0xff]  ;;  %v258_v32 = vld [vmem:[%s2822_s27 + $0x40] sm:$0xff]  ;;  %v259_v33 = vld [vmem:[%s2822_s27 + $0x48] sm:$0xff]  ;;  %v2867_v36 = vpack.c.bf16 %v257_v29, %v256_v28  ;;  %v638_v15 = vsel %vm300_vm0, %v2852_v27, 0 }
  0x18   : > { %2477 = vmatpush3.bf16.msra.mxu0 %v1142_v20  ;;  %2392 = vmatprep.mubr.msk.bf16.mxu1 %vm275_vm1, %v2844_v24  ;;  %v2123_v34 = vld [vmem:[%s2822_s27 + $0x131] sm:$0xff]  ;;  %v2124_v35 = vld [vmem:[%s2822_s27 + $0x139] sm:$0xff]  ;;  %v942_v37 = vpack.c.bf16 %v2105_v31, %v2104_v30  ;;  %v2871_v38 = vpack.c.bf16 %v259_v33, %v258_v32  ;;  %v2125_v42 = vld [vmem:[%s2822_s27 + $0x141] sm:$0xff] }
  0x19   : > { %2464 = vmatprep.mubr.msk.bf16.mxu0 %vm275_vm1, %v941_v25  ;;  %2701 = vmatprep.subr.msk.bf16.mxu0 %vm300_vm0, %v2164_v26  ;;  %v1107_v39 = vpack.c.bf16 %v2124_v35, %v2123_v34  ;;  %v260_v40 = vld [vmem:[%s2822_s27 + $0x50] sm:$0xff]  ;;  %v261_v41 = vld [vmem:[%s2822_s27 + $0x58] sm:$0xff]  ;;  %v262_v44 = vld [vmem:[%s2822_s27 + $0x60] sm:$0xff]  ;;  %v1478_v35 = vsel %vm300_vm0, %v2189_v53, 0 }
  0x1a   : > { %2696 = vmatprep.subr.msk.bf16.mxu1 %vm300_vm0, %v2852_v27  ;;  %v2126_v43 = vld [vmem:[%s2822_s27 + $0x149] sm:$0xff]  ;;  %v2127_v46 = vld [vmem:[%s2822_s27 + $0x151] sm:$0xff]  ;;  %v2128_v47 = vld [vmem:[%s2822_s27 + $0x159] sm:$0xff]  ;;  %v2887_v48 = vpack.c.bf16 %v261_v41, %v260_v40 }
  0x1b   : > { %v263_v45 = vld [vmem:[%s2822_s27 + $0x68] sm:$0xff]  ;;  %v1108_v49 = vpack.c.bf16 %v2126_v43, %v2125_v42  ;;  %v1109_v51 = vpack.c.bf16 %v2128_v47, %v2127_v46  ;;  %v264_v54 = vld [vmem:[%s2822_s27 + $0x70] sm:$0xff]  ;;  %v265_v55 = vld [vmem:[%s2822_s27 + $0x78] sm:$0xff] }
  0x1c   : > { %v2889_v50 = vpack.c.bf16 %v263_v45, %v262_v44  ;;  %v2129_v56 = vld [vmem:[%s2822_s27 + $0x161] sm:$0xff]  ;;  %v2130_v57 = vld [vmem:[%s2822_s27 + $0x169] sm:$0xff]  ;;  %v2023_v58 = vld [vmem:[%s2822_s27 + $0x98] sm:$0xff]  ;;  %v2910_v62 = vpack.c.bf16 %v265_v55, %v264_v54 }
  0x1d   : > { %v2024_v59 = vld [vmem:[%s2822_s27 + $0xa0] sm:$0xff]  ;;  %v2131_v60 = vld [vmem:[%s2822_s27 + $0x171] sm:$0xff]  ;;  %v1110_v63 = vpack.c.bf16 %v2130_v57, %v2129_v56  ;;  %v2025_v4 = vld [vmem:[%s2822_s27 + $0xa8] sm:$0xff] }
  0x1e   : > { %2393 = vmatmul.mubr.msk.bf16.gmra.mrb[4].mxu1 %vm275_vm1, %v2867_v36  ;;  %v2132_v61 = vld [vmem:[%s2822_s27 + $0x179] sm:$0xff]  ;;  %v435_v0 = vpack.c.bf16 %v2024_v59, %v2023_v58  ;;  %v2026_v5 = vld [vmem:[%s2822_s27 + $0xb0] sm:$0xff]  ;;  %v2133_v6 = vld [vmem:[%s2822_s27 + $0x181] sm:$0xff] }
  0x1f   : > { %2465 = vmatmul.mubr.msk.bf16.gmra.mrb[4].mxu0 %vm275_vm1, %v942_v37  ;;  %2396 = vmatprep.mubr.msk.bf16.mxu1 %vm275_vm1, %v2871_v38  ;;  %v1111_v2 = vpack.c.bf16 %v2132_v61, %v2131_v60  ;;  %v2134_v7 = vld [vmem:[%s2822_s27 + $0x189] sm:$0xff]  ;;  %v2027_v8 = vld [vmem:[%s2822_s27 + $0xb8] sm:$0xff]  ;;  %v2028_v9 = vld [vmem:[%s2822_s27 + $0xc0] sm:$0xff]  ;;  %v2925_v12 = vpack.c.bf16 %v2026_v5, %v2025_v4 }
  0x20   : > { %2478 = vmatprep.mubr.msk.bf16.mxu0 %vm275_vm1, %v1107_v39  ;;  %v2135_v10 = vld [vmem:[%s2822_s27 + $0x191] sm:$0xff]  ;;  %v2136_v11 = vld [vmem:[%s2822_s27 + $0x199] sm:$0xff]  ;;  %v1112_v13 = vpack.c.bf16 %v2134_v7, %v2133_v6  ;;  %v2929_v16 = vpack.c.bf16 %v2028_v9, %v2027_v8  ;;  %v2089_v18 = vld [vmem:[%s3157_s1 + $0x6] sm:$0x3] }
  0x21   : > { %v1113_v17 = vpack.c.bf16 %v2136_v11, %v2135_v10  ;;  %v2029_v19 = vld [vmem:[%s2822_s27 + $0xc8] sm:$0xff]  ;;  %v2030_v20 = vld [vmem:[%s2822_s27 + $0xd0] sm:$0xff]  ;;  %v2031_v23 = vld [vmem:[%s2822_s27 + $0xd8] sm:$0xff]  ;;  %v806_v47 = vsel %vm300_vm0, %v2089_v18, 0 }
  0x22   : > { %v2137_v21 = vld [vmem:[%s2822_s27 + $0x1a1] sm:$0xff]  ;;  %v2138_v22 = vld [vmem:[%s2822_s27 + $0x1a9] sm:$0xff]  ;;  %v2947_v26 = vpack.c.bf16 %v2030_v20, %v2029_v19  ;;  %v2035_v31 = vld [vmem:[%s2822_s27 + $0xf8] sm:$0xff] }
  0x23   : > { %v2032_v25 = vld [vmem:[%s2822_s27 + $0xe0] sm:$0xff]  ;;  %v1114_v27 = vpack.c.bf16 %v2138_v22, %v2137_v21  ;;  %v2033_v29 = vld [vmem:[%s2822_s27 + $0xe8] sm:$0xff]  ;;  %v2034_v30 = vld [vmem:[%s2822_s27 + $0xf0] sm:$0xff] }
  0x24   : > { %v2949_v28 = vpack.c.bf16 %v2032_v25, %v2031_v23  ;;  %v2036_v32 = vld [vmem:[%s2822_s27 + $0x100] sm:$0xff]  ;;  %v2962_v33 = vpack.c.bf16 %v2034_v30, %v2033_v29  ;;  %v2214_v37 = vld [vmem:[%s3157_s1 + $0x10] sm:$0x3]  ;;  %v2074_v4 = vld [vmem:[%s2822_s27 + $0x138] sm:$0xff] }
  0x25   : > { %v2964_v34 = vpack.c.bf16 %v2036_v32, %v2035_v31  ;;  %v2038_v39 = vld [vmem:[%s2822_s27 + $0x110] sm:$0xff]  ;;  %v2048_v40 = vld [vmem:[%s2822_s27 + $0x1] sm:$0xff]  ;;  %v2059_v58 = vld [vmem:[%s2822_s27 + $0x59] sm:$0xff] }
  0x26   : > { %2397 = vmatmul.mubr.msk.bf16.gmra.mrb[8].mxu1 %vm275_vm1, %v2887_v48  ;;  %v2049_v41 = vld [vmem:[%s2822_s27 + $0x9] sm:$0xff]  ;;  %v2052_v44 = vld [vmem:[%s2822_s27 + $0x21] sm:$0xff]  ;;  %v2058_v57 = vld [vmem:[%s2822_s27 + $0x51] sm:$0xff] }
  0x27   : > { %2479 = vmatmul.mubr.msk.bf16.vlgmr.msra.gmra.mrb[0].mxu0 %vm275_vm1, %v1108_v49  ;;  %2400 = vmatprep.mubr.msk.bf16.mxu1 %vm275_vm1, %v2889_v50  ;;  %v603_v43 = vpack.c.bf16 %v2049_v41, %v2048_v40  ;;  %v2053_v45 = vld [vmem:[%s2822_s27 + $0x29] sm:$0xff]  ;;  %v3032_v60 = vpack.c.bf16 %v2059_v58, %v2058_v57  ;;  %v2075_v7 = vld [vmem:[%s2822_s27 + $0x140] sm:$0xff]  ;;  %v2078_v10 = vld [vmem:[%s2822_s27 + $0x158] sm:$0xff] }
  0x28   : > { %2495 = vmatpush3.bf16.msra.mxu0 %v1310_v52  ;;  %2482 = vmatprep.mubr.msk.bf16.mxu0 %vm275_vm1, %v1109_v51  ;;  %v2999_v49 = vpack.c.bf16 %v2053_v45, %v2052_v44  ;;  %v2162_v51 = vld [vmem:[%s2822_s27 + $0x80] sm:$0xff]  ;;  %v2163_v52 = vld [vmem:[%s2822_s27 + $0x88] sm:$0xff]  ;;  %v2077_v9 = vld [vmem:[%s2822_s27 + $0x150] sm:$0xff] }
  0x29   : > { %2702 = vmatprep.subr.msk.bf16.mxu0 %vm300_vm0, %v2189_v53  ;;  %v2056_v53 = vld [vmem:[%s2822_s27 + $0x41] sm:$0xff]  ;;  %v2057_v54 = vld [vmem:[%s2822_s27 + $0x49] sm:$0xff]  ;;  %v1282_v55 = vpack.c.bf16 %v2163_v52, %v2162_v51  ;;  %v2082_v19 = vld [vmem:[%s2822_s27 + $0x178] sm:$0xff] }
  0x2a   : > { %v3019_v56 = vpack.c.bf16 %v2057_v54, %v2056_v53  ;;  %v2061_v59 = vld [vmem:[%s2822_s27 + $0x69] sm:$0xff]  ;;  %v2083_v22 = vld [vmem:[%s2822_s27 + $0x180] sm:$0xff] }
  0x2b   : > { %v2076_v8 = vld [vmem:[%s2822_s27 + $0x148] sm:$0xff]  ;;  %v2085_v25 = vld [vmem:[%s2822_s27 + $0x190] sm:$0xff]  ;;  %v2087_v29 = vld [vmem:[%s2822_s27 + $0x1a0] sm:$0xff] }
  0x2c   : > { %v772_v11 = vpack.c.bf16 %v2076_v8, %v2075_v7  ;;  %v2084_v23 = vld [vmem:[%s2822_s27 + $0x188] sm:$0xff]  ;;  %v2107_v32 = vld [vmem:[%s2822_s27 + $0x210] sm:$0xff]  ;;  %v3115_v54 = vld [vmem:[%s3158_s2] ss:$0 sm:$0xff] }
  0x2d   : > { %v2088_v30 = vld [vmem:[%s2822_s27 + $0x1a8] sm:$0xff] }
  0x2e   : > { %2401 = vmatmul.mubr.msk.bf16.gmra.mrb[12].mxu1 %vm275_vm1, %v2910_v62  ;;  %v2106_v31 = vld [vmem:[%s2822_s27 + $0x208] sm:$0xff] }
  0x2f   : > { %2483 = vmatmul.mubr.msk.bf16.gmra.mrb[4].mxu0 %vm275_vm1, %v1110_v63  ;;  %2406 = vmatprep.mubr.msk.bf16.mxu1 %vm275_vm1, %v435_v0  ;;  %v2062_v63 = vld [vmem:[%s2822_s27 + $0x71] sm:$0xff]  ;;  %v2063_v0 = vld [vmem:[%s2822_s27 + $0x79] sm:$0xff] }
  0x30   : > { %2486 = vmatprep.mubr.msk.bf16.mxu0 %vm275_vm1, %v1111_v2  ;;  %v2073_v2 = vld [vmem:[%s2822_s27 + $0x130] sm:$0xff]  ;;  %v610_v5 = vpack.c.bf16 %v2063_v0, %v2062_v63 }
  0x31   : > { %v771_v6 = vpack.c.bf16 %v2074_v4, %v2073_v2 }
  0x36   : > { %2407 = vmatmul.mubr.msk.bf16.vlgmr.msra.gmra.mrb[0].mxu1 %vm275_vm1, %v2925_v12 }
  0x37   : > { %2423 = vmatpush3.bf16.msra.mxu1 %v638_v15  ;;  %2487 = vmatmul.mubr.msk.bf16.gmra.mrb[8].mxu0 %vm275_vm1, %v1112_v13  ;;  %v2079_v13 = vld [vmem:[%s2822_s27 + $0x160] sm:$0xff]  ;;  %v2080_v15 = vld [vmem:[%s2822_s27 + $0x168] sm:$0xff] }
  0x38   : > { %2410 = vmatprep.mubr.msk.bf16.mxu1 %vm275_vm1, %v2929_v16  ;;  %2490 = vmatprep.mubr.msk.bf16.mxu0 %vm275_vm1, %v1113_v17  ;;  %v2188_v17 = vld [vmem:[%s2822_s27 + $0x120] sm:$0xff]  ;;  %v774_v20 = vpack.c.bf16 %v2080_v15, %v2079_v13 }
  0x39   : > { %2697 = vmatprep.subr.msk.bf16.mxu1 %vm300_vm0, %v2089_v18  ;;  %v2081_v18 = vld [vmem:[%s2822_s27 + $0x170] sm:$0xff] }
  0x3a   : > { %v775_v21 = vpack.c.bf16 %v2082_v19, %v2081_v18 }
  0x3e   : > { %2411 = vmatmul.mubr.msk.bf16.gmra.mrb[4].mxu1 %vm275_vm1, %v2947_v26 }
  0x3f   : > { %2491 = vmatmul.mubr.msk.bf16.gmra.mrb[12].mxu0 %vm275_vm1, %v1114_v27  ;;  %2414 = vmatprep.mubr.msk.bf16.mxu1 %vm275_vm1, %v2949_v28  ;;  %v776_v27 = vpack.c.bf16 %v2084_v23, %v2083_v22 }
  0x40   : > { %2496 = vmatprep.mubr.msk.bf16.mxu0 %vm275_vm1, %v2830_v14  ;;  %v2037_v14 = vld [vmem:[%s2822_s27 + $0x108] sm:$0xff] }
  0x41   : > { %v2983_v42 = vpack.c.bf16 %v2038_v39, %v2037_v14  ;;  %v2110_v14 = vld [vmem:[%s2822_s27 + $0x228] sm:$0xff]  ;;  %v2111_v39 = vld [vmem:[%s2822_s27 + $0x230] sm:$0xff] }
  0x42   : > { %v945_v41 = vpack.c.bf16 %v2111_v39, %v2110_v14 }
  0x46   : > { %2415 = vmatmul.mubr.msk.bf16.gmra.mrb[8].mxu1 %vm275_vm1, %v2962_v33 }
  0x47   : > { %2497 = vmatmul.mubr.msk.bf16.vlgmr.msra.gmra.mrb[0].mxu0 %vm275_vm1, %v2844_v24  ;;  %2418 = vmatprep.mubr.msk.bf16.mxu1 %vm275_vm1, %v2964_v34  ;;  %v2050_v24 = vld [vmem:[%s2822_s27 + $0x11] sm:$0xff] }
  0x48   : > { %2513 = vmatpush3.bf16.msra.mxu0 %v1478_v35  ;;  %2500 = vmatprep.mubr.msk.bf16.mxu0 %vm275_vm1, %v2867_v36  ;;  %v2051_v36 = vld [vmem:[%s2822_s27 + $0x19] sm:$0xff] }
  0x49   : > { %2703 = vmatprep.subr.msk.bf16.mxu0 %vm300_vm0, %v2214_v37  ;;  %v2996_v46 = vpack.c.bf16 %v2051_v36, %v2050_v24  ;;  %v2108_v35 = vld [vmem:[%s2822_s27 + $0x218] sm:$0xff]  ;;  %v2212_v24 = vld [vmem:[%s2822_s27 + $0x81] sm:$0xff]  ;;  %v2213_v36 = vld [vmem:[%s2822_s27 + $0x89] sm:$0xff] }
  0x4a   : > { %v1618_v45 = vpack.c.bf16 %v2213_v36, %v2212_v24 }
  0x4e   : > { %2419 = vmatmul.mubr.msk.bf16.gmra.mrb[12].mxu1 %vm275_vm1, %v2983_v42 }
  0x4f   : > { %2501 = vmatmul.mubr.msk.bf16.gmra.mrb[4].mxu0 %vm275_vm1, %v2871_v38  ;;  %2424 = vmatprep.mubr.msk.bf16.mxu1 %vm275_vm1, %v603_v43  ;;  %v2054_v38 = vld [vmem:[%s2822_s27 + $0x31] sm:$0xff]  ;;  %v2113_v43 = vld [vmem:[%s2822_s27 + $0x240] sm:$0xff] }
  0x50   : > { %2504 = vmatprep.mubr.msk.bf16.mxu0 %vm275_vm1, %v2887_v48  ;;  %v2055_v48 = vld [vmem:[%s2822_s27 + $0x39] sm:$0xff] }
  0x56   : > { %2425 = vmatmul.mubr.msk.bf16.vlgmr.msra.gmra.mrb[0].mxu1 %vm275_vm1, %v2996_v46 }
  0x57   : > { %2441 = vmatpush3.bf16.msra.mxu1 %v806_v47  ;;  %2505 = vmatmul.mubr.msk.bf16.gmra.mrb[8].mxu0 %vm275_vm1, %v2889_v50  ;;  %v3017_v50 = vpack.c.bf16 %v2055_v48, %v2054_v38 }
  0x58   : > { %2428 = vmatprep.mubr.msk.bf16.mxu1 %vm275_vm1, %v2999_v49  ;;  %2508 = vmatprep.mubr.msk.bf16.mxu0 %vm275_vm1, %v2910_v62  ;;  %v1646_v62 = vsel %vm300_vm0, %v2214_v37, 0  ;;  %v2109_v37 = vld [vmem:[%s2822_s27 + $0x220] sm:$0xff] }
  0x59   : > { %2699 = vmatprep.subr.msk.bf16.mxu1 %vm300_vm0, %v2797_v1  ;;  %v2060_v1 = vld [vmem:[%s2822_s27 + $0x61] sm:$0xff]  ;;  %v944_v40 = vpack.c.bf16 %v2109_v37, %v2108_v35 }
  0x5a   : > { %v3034_v61 = vpack.c.bf16 %v2061_v59, %v2060_v1 }
  0x5e   : > { %2429 = vmatmul.mubr.msk.bf16.gmra.mrb[4].mxu1 %vm275_vm1, %v3017_v50 }
  0x5f   : > { %2509 = vmatmul.mubr.msk.bf16.gmra.mrb[12].mxu0 %vm275_vm1, %v1282_v55  ;;  %2432 = vmatprep.mubr.msk.bf16.mxu1 %vm275_vm1, %v3019_v56 }
  0x60   : > { %2514 = vmatprep.mubr.msk.bf16.mxu0 %vm275_vm1, %v2925_v12  ;;  %v773_v12 = vpack.c.bf16 %v2078_v10, %v2077_v9 }
  0x66   : > { %2433 = vmatmul.mubr.msk.bf16.gmra.mrb[8].mxu1 %vm275_vm1, %v3032_v60 }
  0x67   : > { %2515 = vmatmul.mubr.msk.bf16.vlgmr.msra.gmra.mrb[0].mxu0 %vm275_vm1, %v2929_v16  ;;  %2436 = vmatprep.mubr.msk.bf16.mxu1 %vm275_vm1, %v3034_v61  ;;  %v2187_v16 = vld [vmem:[%s2822_s27 + $0x118] sm:$0xff] }
  0x68   : > { %2531 = vmatpush3.bf16.msra.mxu0 %v1646_v62  ;;  %2518 = vmatprep.mubr.msk.bf16.mxu0 %vm275_vm1, %v2947_v26  ;;  %v2086_v26 = vld [vmem:[%s2822_s27 + $0x198] sm:$0xff] }
  0x6e   : > { %2437 = vmatmul.mubr.msk.bf16.gmra.mrb[12].mxu1 %vm275_vm1, %v610_v5 }
  0x6f   : > { %2519 = vmatmul.mubr.msk.bf16.gmra.mrb[4].mxu0 %vm275_vm1, %v2949_v28  ;;  %2442 = vmatprep.mubr.msk.bf16.mxu1 %vm275_vm1, %v771_v6  ;;  %v777_v28 = vpack.c.bf16 %v2086_v26, %v2085_v25 }
  0x70   : > { %2522 = vmatprep.mubr.msk.bf16.mxu0 %vm275_vm1, %v2962_v33  ;;  %v778_v33 = vpack.c.bf16 %v2088_v30, %v2087_v29 }
  0x76   : > { %2443 = vmatmul.mubr.msk.bf16.vlgmr.msra.gmra.mrb[0].mxu1 %vm275_vm1, %v772_v11 }
  0x77   : > { %2549 = vmatpush3.bf16.msra.mxu1 %v2805_v3  ;;  %2523 = vmatmul.mubr.msk.bf16.gmra.mrb[8].mxu0 %vm275_vm1, %v2964_v34  ;;  %v1450_v3 = vpack.c.bf16 %v2188_v17, %v2187_v16  ;;  %v943_v34 = vpack.c.bf16 %v2107_v32, %v2106_v31 }
  0x78   : > { %2446 = vmatprep.mubr.msk.bf16.mxu1 %vm275_vm1, %v773_v12  ;;  %2526 = vmatprep.mubr.msk.bf16.mxu0 %vm275_vm1, %v2983_v42  ;;  %v2112_v42 = vld [vmem:[%s2822_s27 + $0x238] sm:$0xff] }
  0x79   : > { %v946_v44 = vpack.c.bf16 %v2113_v43, %v2112_v42 }
  0x7e   : > { %2447 = vmatmul.mubr.msk.bf16.gmra.mrb[4].mxu1 %vm275_vm1, %v774_v20 }
  0x7f   : > { %2527 = vmatmul.mubr.msk.bf16.gmra.mrb[12].mxu0 %vm275_vm1, %v1450_v3  ;;  %2450 = vmatprep.mubr.msk.bf16.mxu1 %vm275_vm1, %v775_v21 }
  0x80   : > { %2532 = vmatprep.mubr.msk.bf16.mxu0 %vm275_vm1, %v2996_v46 }
  0x86   : > { %2451 = vmatmul.mubr.msk.bf16.gmra.mrb[8].mxu1 %vm275_vm1, %v776_v27 }
  0x87   : > { %2533 = vmatmul.mubr.msk.bf16.vlgmr.msra.gmra.mrb[0].mxu0 %vm275_vm1, %v2999_v49  ;;  %2454 = vmatprep.mubr.msk.bf16.mxu1 %vm275_vm1, %v777_v28 }
  0x88   : > { %2536 = vmatprep.mubr.msk.bf16.mxu0 %vm275_vm1, %v3017_v50 }
  0x8e   : > { %2455 = vmatmul.mubr.msk.bf16.gmra.mrb[12].mxu1 %vm275_vm1, %v778_v33 }
  0x8f   : > { %2537 = vmatmul.mubr.msk.bf16.gmra.mrb[4].mxu0 %vm275_vm1, %v3019_v56  ;;  %2468 = vmatprep.mubr.msk.bf16.mxu1 %vm275_vm1, %v943_v34 }
  0x90   : > { %2540 = vmatprep.mubr.msk.bf16.mxu0 %vm275_vm1, %v3032_v60 }
  0x96   : > { %2469 = vmatmul.mubr.msk.bf16.vlgmr.msra.gmra.mrb[8].mxu1 %vm275_vm1, %v944_v40 }
  0x97   : > { %2541 = vmatmul.mubr.msk.bf16.gmra.mrb[8].mxu0 %vm275_vm1, %v3034_v61  ;;  %2472 = vmatprep.mubr.msk.bf16.mxu1 %vm275_vm1, %v945_v41 }
  0x98   : > { %2544 = vmatprep.mubr.msk.bf16.mxu0 %vm275_vm1, %v610_v5 }
  0x9e   : > { %2473 = vmatmul.mubr.msk.bf16.gmra.mrb[12].mxu1 %vm275_vm1, %v946_v44 }
  0x9f   : > { %2545 = vmatmul.mubr.msk.bf16.gmra.mrb[12].mxu0 %vm275_vm1, %v1618_v45 }
 0x149   : > { %v2444_v46 = vpop.f32.mrb[0].mxu1 }
 0x14a   : > { %v842_v47 = vpop.f32.mrb[1].mxu1  ;;  %v2550_v50 = vadd.f32 %v2444_v46, %v3115_v54 }
 0x14b   : > { %v2445_v49 = vpop.f32.mrb[2].mxu1  ;;  %v2552_v55 = vadd.f32 %v3115_v54, %v842_v47 }
 0x14c   : > { %v845_v38 = vpop.f32.mrb[3].mxu1  ;;  %v2554_v57 = vadd.f32 %v2445_v49, %v3115_v54 }
 0x14d   : > { %v2556_v59 = vadd.f32 %v3115_v54, %v845_v38 }
 0x151   : > { %v2448_v48 = vpop.f32.mrb[4].mxu1 }
 0x152   : > { %v858_v51 = vpop.f32.mrb[5].mxu1  ;;  %v2558_v7 = vadd.f32 %v2448_v48, %v3115_v54 }
 0x153   : > { %v2449_v52 = vpop.f32.mrb[6].mxu1  ;;  %v2560_v9 = vadd.f32 %v3115_v54, %v858_v51 }
 0x154   : > { %v861_v53 = vpop.f32.mrb[7].mxu1  ;;  %v2562_v12 = vadd.f32 %v2449_v52, %v3115_v54 }
 0x155   : > { %v2564_v16 = vadd.f32 %v3115_v54, %v861_v53 }
 0x15a   : > { %v2534_v56 = vpop.f32.mrb[0].mxu0 }
 0x15b   : > { %v2551_v58 = vadd.f32 %v2550_v50, %v2534_v56  ;;  %v1682_v1 = vpop.f32.mrb[1].mxu0 }
 0x15c   : > { %v2553_v60 = vadd.f32 %v2552_v55, %v1682_v1  ;;  %v2535_v61 = vpop.f32.mrb[2].mxu0 }
 0x15d   : > { %v2555_v62 = vadd.f32 %v2554_v57, %v2535_v61  ;;  %v1685_v63 = vpop.f32.mrb[3].mxu0  ;;  %v1763_v2 = vmax.f32 %v2551_v58, 0.0 }
 0x15e   : > { %v2557_v0 = vadd.f32 %v2556_v59, %v1685_v63  ;;  %v1761_v5 = vmax.f32 %v2553_v60, 0.0 }
 0x15f   : > { %v1764_v4 = vmax.f32 %v2555_v62, 0.0 }
 0x160   : > { %v1762_v6 = vmax.f32 %v2557_v0, 0.0 }
 0x161   : > { %v2266_v8 = vpack.c.bf16 %v1764_v4, %v1763_v2 }
 0x162   : > { %v2261_v10 = vpack.c.bf16 %v1762_v6, %v1761_v5  ;;  %v2538_v11 = vpop.f32.mrb[4].mxu0 }
 0x163   : > { %2298 = vst [vmem:[%s3125_s20 + $0x8] sm:$0xff] %v2266_v8   ;;  %v2559_v13 = vadd.f32 %v2558_v7, %v2538_v11  ;;  %v1698_v15 = vpop.f32.mrb[5].mxu0 }
 0x164   : > { %2262 = vst [vmem:[%s3125_s20] sm:$0xff] %v2261_v10   ;;  %v2561_v17 = vadd.f32 %v2560_v9, %v1698_v15  ;;  %v2539_v18 = vpop.f32.mrb[6].mxu0 }
 0x165   : > { %v2563_v19 = vadd.f32 %v2562_v12, %v2539_v18  ;;  %v1701_v20 = vpop.f32.mrb[7].mxu0  ;;  %v1767_v21 = vmax.f32 %v2559_v13, 0.0 }
 0x166   : > { %v2565_v3 = vadd.f32 %v2564_v16, %v1701_v20  ;;  %v1765_v23 = vmax.f32 %v2561_v17, 0.0 }
 0x167   : > { %v1768_v22 = vmax.f32 %v2563_v19, 0.0 }
 0x168   : > { %v1766_v25 = vmax.f32 %v2565_v3, 0.0 }
 0x169   : > { %v2276_v26 = vpack.c.bf16 %v1768_v22, %v1767_v21  ;;  %v2470_v27 = vpop.f32.mrb[8].mxu1 }
 0x16a   : > { %v2271_v28 = vpack.c.bf16 %v1766_v25, %v1765_v23  ;;  %v2566_v29 = vadd.f32 %v2470_v27, %v3115_v54  ;;  %v2542_v30 = vpop.f32.mrb[8].mxu0  ;;  %v1042_v31 = vpop.f32.mrb[9].mxu1 }
 0x16b   : > { %2300 = vst [vmem:[%s3125_s20 + $0x18] sm:$0xff] %v2276_v26   ;;  %v2568_v32 = vadd.f32 %v3115_v54, %v1042_v31  ;;  %v1714_v33 = vpop.f32.mrb[9].mxu0  ;;  %v2471_v34 = vpop.f32.mrb[10].mxu1 }
 0x16c   : > { %2299 = vst [vmem:[%s3125_s20 + $0x10] sm:$0xff] %v2271_v28   ;;  %v2567_v35 = vadd.f32 %v2566_v29, %v2542_v30  ;;  %v2570_v37 = vadd.f32 %v2471_v34, %v3115_v54  ;;  %v2543_v14 = vpop.f32.mrb[10].mxu0  ;;  %v1045_v39 = vpop.f32.mrb[11].mxu1 }
 0x16d   : > { %v2569_v40 = vadd.f32 %v2568_v32, %v1714_v33  ;;  %v2572_v41 = vadd.f32 %v3115_v54, %v1045_v39  ;;  %v1717_v42 = vpop.f32.mrb[11].mxu0 }
 0x16e   : > { %v2571_v43 = vadd.f32 %v2570_v37, %v2543_v14  ;;  %v1771_v36 = vmax.f32 %v2567_v35, 0.0 }
 0x16f   : > { %v2573_v24 = vadd.f32 %v2572_v41, %v1717_v42  ;;  %v1769_v45 = vmax.f32 %v2569_v40, 0.0 }
 0x170   : > { %v1772_v44 = vmax.f32 %v2571_v43, 0.0 }
 0x171   : > { %v1770_v46 = vmax.f32 %v2573_v24, 0.0  ;;  %v2474_v47 = vpop.f32.mrb[12].mxu1 }
 0x172   : > { %v2286_v49 = vpack.c.bf16 %v1772_v44, %v1771_v36  ;;  %v2574_v38 = vadd.f32 %v2474_v47, %v3115_v54  ;;  %v2546_v48 = vpop.f32.mrb[12].mxu0  ;;  %v1058_v51 = vpop.f32.mrb[13].mxu1 }
 0x173   : > { %v2281_v52 = vpack.c.bf16 %v1770_v46, %v1769_v45  ;;  %v2576_v53 = vadd.f32 %v3115_v54, %v1058_v51  ;;  %v1730_v50 = vpop.f32.mrb[13].mxu0  ;;  %v2475_v55 = vpop.f32.mrb[14].mxu1 }
 0x174   : > { %2302 = vst [vmem:[%s3125_s20 + $0x28] sm:$0xff] %v2286_v49   ;;  %v2575_v56 = vadd.f32 %v2574_v38, %v2546_v48  ;;  %v2578_v57 = vadd.f32 %v2475_v55, %v3115_v54  ;;  %v2547_v58 = vpop.f32.mrb[14].mxu0  ;;  %v1061_v1 = vpop.f32.mrb[15].mxu1 }
 0x175   : > { %2301 = vst [vmem:[%s3125_s20 + $0x20] sm:$0xff] %v2281_v52   ;;  %v2577_v59 = vadd.f32 %v2576_v53, %v1730_v50  ;;  %v2580_v60 = vadd.f32 %v3115_v54, %v1061_v1  ;;  %v1733_v61 = vpop.f32.mrb[15].mxu0 }
 0x176   : > { %v2579_v62 = vadd.f32 %v2578_v57, %v2547_v58  ;;  %v1775_v0 = vmax.f32 %v2575_v56, 0.0 }
 0x177   : > { %v2581_v63 = vadd.f32 %v2580_v60, %v1733_v61  ;;  %v1773_v4 = vmax.f32 %v2577_v59, 0.0 }
 0x178   : > { %v1776_v2 = vmax.f32 %v2579_v62, 0.0 }
 0x179   : > { %v1774_v5 = vmax.f32 %v2581_v63, 0.0 }
 0x17a   : > { %v2296_v6 = vpack.c.bf16 %v1776_v2, %v1775_v0 }
 0x17b   : > { %v2291_v7 = vpack.c.bf16 %v1774_v5, %v1773_v4 }
 0x17c   : > { %2304 = vst [vmem:[%s3125_s20 + $0x38] sm:$0xff] %v2296_v6  }
 0x17d   : > { %2303 = vst [vmem:[%s3125_s20 + $0x30] sm:$0xff] %v2291_v7  }
 0x17e PF: > { %s13_s14 = sadd.s32 1, %s2751_s14   ;;  %s3160_s12 = smov %s2747_s13 }
 0x17f   : > { %p10_p5 = scmp.ge.s32.totalorder %s13_s14, 4   ;;  %s3161_s13 = smov %s3163_s15 }
 0x181   :  { %12 = sbr.rel (!%p10_p5) target bundleno = 2 (0x2), region = 85 }

// kernel: basic_block_forward.3
= control target key start
LH: loop header
LB: loop body
LE: loop exit
PB: predicated region body
PF: predicated region fallthrough
CT: control target
= control target key end

     0   :  { %s3048_s18 = smov 0   ;;  %s3050_s19 = smov 0   ;;  %s3440_s0 = inlined_call_operand.vmem [shape: f32[2,1,1,162,8], index: 0, kind: input, shape index: {}]   ;;  %s3441_s1 = inlined_call_operand.vmem [shape: bf16[9,8,128], index: 1, kind: input, shape index: {}]   ;;  %s3442_s2 = inlined_call_operand.vmem [shape: f32[1,128], index: 2, kind: input, shape index: {}]   ;;  %s3443_s3 = inlined_call_operand.vmem [shape: bf16[2,128,4], index: 3, kind: input, shape index: {}]   ;;  %s3444_s4 = inlined_call_operand.vmem [shape: bf16[4,128], index: 4, kind: input, shape index: {}]   ;;  %s3445_s5 = inlined_call_operand.vmem [shape: f32[2,128,128], index: 5, kind: output, shape index: {}]  }
   0x1   :  { %s3052_s20 = smov 0  }
   0x2 LB: > { %s34_s21 = sadd.s32 1, %s3012_s19  ;;  %p2286_p0 = scmp.ge.s32.totalorder %s3016_s20, 1  ;;  %s3016_s20 = sphi %s3052_s20, %s15_s20   ;;  %s3012_s19 = sphi %s3050_s19, %s3447_s19   ;;  %s3008_s18 = sphi %s3048_s18, %s3446_s18  }
   0x3   : > { %p36_p1 = scmp.ge.s32.totalorder %s34_s21, 2  ;;  %p253_p2 = scmp.lt.s32.totalorder %s3016_s20, 3 }
   0x5   : > { %s3449_s21 = smov (%p36_p1, %s34_s21), 0  ;;  %p254_p3 = pnand %p2286_p0, %p253_p2 }
   0x6   : > { %v381_v0 = vld [vmem:[%s3441_s1] sm:$0xf] (!%p254_p3)  ;;  %vm407_vm0 = vcmask (!%p254_p3), 1043456   ;;  %v2417_v1 = vld [vmem:[%s3441_s1 + $0x14] sm:$0xf] (!%p254_p3)  ;;  %p308_p4 = scmp.lt.s32.totalorder (!%p254_p3), %s3008_s18, 1 }
   0x7   : > { %257 = sbr.rel (%p254_p3) target bundleno = 397 (0x18d), region = 40  ;;  %2951 = vmatprep.subr.msk.bf16.mxu1 (!%p254_p3), %vm407_vm0, %v381_v0  ;;  %v409_v2 = vsel (!%p254_p3), %vm407_vm0, %v381_v0, 0  ;;  %2956 = vmatprep.subr.msk.bf16.mxu0 (!%p254_p3), %vm407_vm0, %v2417_v1  ;;  %v1249_v3 = vsel (!%p254_p3), %vm407_vm0, %v2417_v1, 0  ;;  %v2317_v4 = vld [vmem:[%s3441_s1 + $0x4] sm:$0xf] (!%p254_p3)  ;;  %vm382_vm1 = vcmask (!%p254_p3), 64512  }
   0x8   : > { %2612 = vmatpush3.bf16.msra.mxu1 (!%p254_p3), %v409_v2  ;;  %2702 = vmatpush3.bf16.msra.mxu0 (!%p254_p3), %v1249_v3  ;;  %v2442_v5 = vld [vmem:[%s3441_s1 + $0x18] sm:$0xf] (!%p254_p3)  ;;  %v577_v15 = vsel (!%p254_p3), %vm407_vm0, %v2317_v4, 0  ;;  %v2342_v26 = vld [vmem:[%s3441_s1 + $0x8] sm:$0xf] (!%p254_p3)  ;;  %vm1950_vm2 = vcmask (!%p254_p3), 1041408  }
   0x9   : > { %2952 = vmatprep.subr.msk.bf16.mxu1 (!%p254_p3), %vm407_vm0, %v2317_v4  ;;  %2957 = vmatprep.subr.msk.bf16.mxu0 (!%p254_p3), %vm407_vm0, %v2442_v5  ;;  %v1417_v20 = vsel (!%p254_p3), %vm407_vm0, %v2442_v5, 0  ;;  %v2467_v27 = vld [vmem:[%s3441_s1 + $0x1c] sm:$0xf] (!%p254_p3)  ;;  %v745_v2 = vsel (!%p254_p3), %vm407_vm0, %v2342_v26, 0  ;;  %v2367_v5 = vld [vmem:[%s3441_s1 + $0xc] sm:$0xf] (!%p254_p3) }
   0xa   : > { %v1585_v4 = vsel (!%p254_p3), %vm407_vm0, %v2467_v27, 0  ;;  %vm1925_vm3 = vcmask (!%p254_p3), 31744  }
   0xe   : > { %s3451_s18 = smov (!%p308_p4, %s3008_s18), 1 }
   0xf   : > { %s2961_s30 = smul.u32 168, %s3451_s18  ;;  %s2519_s6 = sshll.u32 %s3451_s18, 6 }
  0x10   : > { %s3091_s9 = scalar_lea.vmem %s3443_s3, %s2519_s6  ;;  %s2520_s6 = sshll.u32 %s3451_s18, 7 }
  0x11   : > { %s3096_s12 = scalar_lea.vmem %s3440_s0, %s2961_s30 }
  0x12   : > { %v357_v6 = vld [vmem:[%s3096_s12] sm:$0xff]  ;;  %v358_v7 = vld [vmem:[%s3096_s12 + $0x8] sm:$0xff]  ;;  %v2401_v8 = vld [vmem:[%s3096_s12 + $0x12] sm:$0xff] }
  0x13   : > { %v373_v9 = vpack.c.bf16 %v358_v7, %v357_v6  ;;  %v2402_v10 = vld [vmem:[%s3096_s12 + $0x1a] sm:$0xff]  ;;  %v359_v11 = vld [vmem:[%s3096_s12 + $0x10] sm:$0xff]  ;;  %v2403_v16 = vld [vmem:[%s3096_s12 + $0x22] sm:$0xff] }
  0x14   : > { %v360_v12 = vld [vmem:[%s3096_s12 + $0x18] sm:$0xff]  ;;  %v3104_v13 = vpack.c.bf16 %v2402_v10, %v2401_v8  ;;  %v2404_v17 = vld [vmem:[%s3096_s12 + $0x2a] sm:$0xff]  ;;  %v361_v18 = vld [vmem:[%s3096_s12 + $0x20] sm:$0xff] }
  0x15   : > { %v3106_v14 = vpack.c.bf16 %v360_v12, %v359_v11  ;;  %2613 = vmatprep.mubr.msk.bf16.mxu1 %vm382_vm1, %v373_v9  ;;  %v3113_v19 = vpack.c.bf16 %v2404_v17, %v2403_v16  ;;  %v362_v21 = vld [vmem:[%s3096_s12 + $0x28] sm:$0xff]  ;;  %v2405_v22 = vld [vmem:[%s3096_s12 + $0x32] sm:$0xff]  ;;  %v2406_v23 = vld [vmem:[%s3096_s12 + $0x3a] sm:$0xff] }
  0x16   : > { %2703 = vmatprep.mubr.msk.bf16.mxu0 %vm382_vm1, %v3104_v13  ;;  %v3123_v24 = vpack.c.bf16 %v362_v21, %v361_v18  ;;  %v3125_v25 = vpack.c.bf16 %v2406_v23, %v2405_v22  ;;  %v363_v28 = vld [vmem:[%s3096_s12 + $0x30] sm:$0xff]  ;;  %v364_v29 = vld [vmem:[%s3096_s12 + $0x38] sm:$0xff]  ;;  %v2407_v30 = vld [vmem:[%s3096_s12 + $0x42] sm:$0xff] }
  0x17   : > { %2614 = vmatmul.mubr.msk.bf16.vlgmr.msra.gmra.mrb[0].mxu1 %vm382_vm1, %v3106_v14  ;;  %2704 = vmatmul.mubr.msk.bf16.vlgmr.msra.gmra.mrb[0].mxu0 %vm382_vm1, %v3113_v19  ;;  %v2408_v31 = vld [vmem:[%s3096_s12 + $0x4a] sm:$0xff]  ;;  %v365_v32 = vld [vmem:[%s3096_s12 + $0x40] sm:$0xff]  ;;  %v2409_v34 = vld [vmem:[%s3096_s12 + $0x52] sm:$0xff]  ;;  %v3148_v36 = vpack.c.bf16 %v364_v29, %v363_v28 }
  0x18   : > { %2630 = vmatpush3.bf16.msra.mxu1 %v577_v15  ;;  %2720 = vmatpush3.bf16.msra.mxu0 %v1417_v20  ;;  %v366_v33 = vld [vmem:[%s3096_s12 + $0x48] sm:$0xff]  ;;  %v2410_v35 = vld [vmem:[%s3096_s12 + $0x5a] sm:$0xff]  ;;  %v3151_v37 = vpack.c.bf16 %v2408_v31, %v2407_v30  ;;  %v367_v40 = vld [vmem:[%s3096_s12 + $0x50] sm:$0xff] }
  0x19   : > { %2617 = vmatprep.mubr.msk.bf16.mxu1 %vm382_vm1, %v3123_v24  ;;  %2707 = vmatprep.mubr.msk.bf16.mxu0 %vm382_vm1, %v3125_v25  ;;  %v3153_v38 = vpack.c.bf16 %v366_v33, %v365_v32  ;;  %v3155_v39 = vpack.c.bf16 %v2410_v35, %v2409_v34  ;;  %v368_v41 = vld [vmem:[%s3096_s12 + $0x58] sm:$0xff]  ;;  %v2411_v42 = vld [vmem:[%s3096_s12 + $0x62] sm:$0xff]  ;;  %v2412_v43 = vld [vmem:[%s3096_s12 + $0x6a] sm:$0xff] }
  0x1a   : > { %2953 = vmatprep.subr.msk.bf16.mxu1 %vm407_vm0, %v2342_v26  ;;  %2958 = vmatprep.subr.msk.bf16.mxu0 %vm407_vm0, %v2467_v27  ;;  %v369_v44 = vld [vmem:[%s3096_s12 + $0x60] sm:$0xff]  ;;  %v370_v45 = vld [vmem:[%s3096_s12 + $0x68] sm:$0xff]  ;;  %v2413_v46 = vld [vmem:[%s3096_s12 + $0x72] sm:$0xff]  ;;  %v3173_v48 = vpack.c.bf16 %v368_v41, %v367_v40  ;;  %v3175_v49 = vpack.c.bf16 %v2412_v43, %v2411_v42  ;;  %v913_v40 = vsel %vm407_vm0, %v2367_v5, 0 }
  0x1b   : > { %v2414_v47 = vld [vmem:[%s3096_s12 + $0x7a] sm:$0xff]  ;;  %v3177_v50 = vpack.c.bf16 %v370_v45, %v369_v44  ;;  %v371_v52 = vld [vmem:[%s3096_s12 + $0x70] sm:$0xff]  ;;  %v2415_v54 = vld [vmem:[%s3096_s12 + $0x82] sm:$0xff] }
  0x1c   : > { %v3179_v51 = vpack.c.bf16 %v2414_v47, %v2413_v46  ;;  %v372_v53 = vld [vmem:[%s3096_s12 + $0x78] sm:$0xff]  ;;  %v2416_v55 = vld [vmem:[%s3096_s12 + $0x8a] sm:$0xff]  ;;  %v2301_v56 = vld [vmem:[%s3096_s12 + $0x1] sm:$0xff] }
  0x1d   : > { %v2302_v57 = vld [vmem:[%s3096_s12 + $0x9] sm:$0xff]  ;;  %v3195_v58 = vpack.c.bf16 %v372_v53, %v371_v52  ;;  %v3197_v59 = vpack.c.bf16 %v2416_v55, %v2415_v54  ;;  %v2303_v61 = vld [vmem:[%s3096_s12 + $0x11] sm:$0xff]  ;;  %v2304_v62 = vld [vmem:[%s3096_s12 + $0x19] sm:$0xff] }
  0x1e   : > { %v542_v60 = vpack.c.bf16 %v2302_v57, %v2301_v56  ;;  %v2305_v63 = vld [vmem:[%s3096_s12 + $0x21] sm:$0xff]  ;;  %v2306_v0 = vld [vmem:[%s3096_s12 + $0x29] sm:$0xff]  ;;  %v3210_v1 = vpack.c.bf16 %v2304_v62, %v2303_v61  ;;  %v2307_v6 = vld [vmem:[%s3096_s12 + $0x31] sm:$0xff] }
  0x1f   : > { %2618 = vmatmul.mubr.msk.bf16.gmra.mrb[4].mxu1 %vm382_vm1, %v3148_v36  ;;  %2708 = vmatmul.mubr.msk.bf16.gmra.mrb[4].mxu0 %vm382_vm1, %v3151_v37  ;;  %v3213_v3 = vpack.c.bf16 %v2306_v0, %v2305_v63  ;;  %v2308_v7 = vld [vmem:[%s3096_s12 + $0x39] sm:$0xff]  ;;  %v2309_v9 = vld [vmem:[%s3096_s12 + $0x41] sm:$0xff]  ;;  %v2310_v10 = vld [vmem:[%s3096_s12 + $0x49] sm:$0xff] }
  0x20   : > { %2621 = vmatprep.mubr.msk.bf16.mxu1 %vm382_vm1, %v3153_v38  ;;  %2711 = vmatprep.mubr.msk.bf16.mxu0 %vm382_vm1, %v3155_v39  ;;  %v2492_v8 = vld [vmem:[%s3441_s1 + $0x20] sm:$0xf]  ;;  %v3235_v11 = vpack.c.bf16 %v2308_v7, %v2307_v6  ;;  %v3238_v12 = vpack.c.bf16 %v2310_v10, %v2309_v9  ;;  %v2311_v15 = vld [vmem:[%s3096_s12 + $0x51] sm:$0xff]  ;;  %v2314_v18 = vld [vmem:[%s3096_s12 + $0x69] sm:$0xff] }
  0x21   : > { %v2312_v16 = vld [vmem:[%s3096_s12 + $0x59] sm:$0xff]  ;;  %v2313_v17 = vld [vmem:[%s3096_s12 + $0x61] sm:$0xff]  ;;  %v2315_v27 = vld [vmem:[%s3096_s12 + $0x71] sm:$0xff]  ;;  %v1753_v41 = vsel %vm407_vm0, %v2492_v8, 0 }
  0x22   : > { %v2438_v20 = vld [vmem:[%s3096_s12 + $0x80] sm:$0xff]  ;;  %v2439_v21 = vld [vmem:[%s3096_s12 + $0x88] sm:$0xff]  ;;  %v3254_v22 = vpack.c.bf16 %v2312_v16, %v2311_v15  ;;  %v3256_v23 = vpack.c.bf16 %v2314_v18, %v2313_v17  ;;  %v2440_v29 = vld [vmem:[%s3096_s12 + $0x90] sm:$0xff] }
  0x23   : > { %v3258_v26 = vpack.c.bf16 %v2439_v21, %v2438_v20  ;;  %v2316_v28 = vld [vmem:[%s3096_s12 + $0x79] sm:$0xff]  ;;  %v2326_v31 = vld [vmem:[%s3096_s12 + $0x2] sm:$0xff]  ;;  %v2327_v32 = vld [vmem:[%s3096_s12 + $0xa] sm:$0xff] }
  0x24   : > { %v2441_v30 = vld [vmem:[%s3096_s12 + $0x98] sm:$0xff]  ;;  %v3274_v33 = vpack.c.bf16 %v2316_v28, %v2315_v27  ;;  %v710_v35 = vpack.c.bf16 %v2327_v32, %v2326_v31  ;;  %v2392_v42 = vld [vmem:[%s3441_s1 + $0x10] sm:$0xf]  ;;  %v1884_v43 = vld [vmem:[%s3444_s4] sm:$0x3] }
  0x25   : > { %v1389_v34 = vpack.c.bf16 %v2441_v30, %v2440_v29  ;;  %v2464_v44 = vld [vmem:[%s3096_s12 + $0x89] sm:$0xff]  ;;  %v2465_v46 = vld [vmem:[%s3096_s12 + $0x91] sm:$0xff]  ;;  %v2466_v47 = vld [vmem:[%s3096_s12 + $0x99] sm:$0xff]  ;;  %v1081_v53 = vsel %vm407_vm0, %v2392_v42, 0  ;;  %v1952_v54 = vsel %vm1950_vm2, %v1884_v43, 0 }
  0x26   : > { %v1557_v52 = vpack.c.bf16 %v2466_v47, %v2465_v46 }
  0x27   : > { %2622 = vmatmul.mubr.msk.bf16.gmra.mrb[8].mxu1 %vm382_vm1, %v3173_v48  ;;  %2712 = vmatmul.mubr.msk.bf16.gmra.mrb[8].mxu0 %vm382_vm1, %v3175_v49 }
  0x28   : > { %2625 = vmatprep.mubr.msk.bf16.mxu1 %vm382_vm1, %v3177_v50  ;;  %2715 = vmatprep.mubr.msk.bf16.mxu0 %vm382_vm1, %v3179_v51 }
  0x2f   : > { %2626 = vmatmul.mubr.msk.bf16.gmra.mrb[12].mxu1 %vm382_vm1, %v3195_v58  ;;  %2716 = vmatmul.mubr.msk.bf16.gmra.mrb[12].mxu0 %vm382_vm1, %v3197_v59 }
  0x30   : > { %2631 = vmatprep.mubr.msk.bf16.mxu1 %vm382_vm1, %v542_v60  ;;  %2721 = vmatprep.mubr.msk.bf16.mxu0 %vm382_vm1, %v3123_v24 }
  0x37   : > { %2632 = vmatmul.mubr.msk.bf16.vlgmr.msra.gmra.mrb[0].mxu1 %vm382_vm1, %v3210_v1  ;;  %2722 = vmatmul.mubr.msk.bf16.vlgmr.msra.gmra.mrb[0].mxu0 %vm382_vm1, %v3148_v36 }
  0x38   : > { %2648 = vmatpush3.bf16.msra.mxu1 %v745_v2  ;;  %2738 = vmatpush3.bf16.msra.mxu0 %v1585_v4 }
  0x39   : > { %2635 = vmatprep.mubr.msk.bf16.mxu1 %vm382_vm1, %v3213_v3  ;;  %2725 = vmatprep.mubr.msk.bf16.mxu0 %vm382_vm1, %v3153_v38 }
  0x3a   : > { %2954 = vmatprep.subr.msk.bf16.mxu1 %vm407_vm0, %v2367_v5  ;;  %2959 = vmatprep.subr.msk.bf16.mxu0 %vm407_vm0, %v2492_v8 }
  0x3f   : > { %2636 = vmatmul.mubr.msk.bf16.gmra.mrb[4].mxu1 %vm382_vm1, %v3235_v11  ;;  %2726 = vmatmul.mubr.msk.bf16.gmra.mrb[4].mxu0 %vm382_vm1, %v3173_v48 }
  0x40   : > { %2639 = vmatprep.mubr.msk.bf16.mxu1 %vm382_vm1, %v3238_v12  ;;  %2729 = vmatprep.mubr.msk.bf16.mxu0 %vm382_vm1, %v3177_v50 }
  0x47   : > { %2640 = vmatmul.mubr.msk.bf16.gmra.mrb[8].mxu1 %vm382_vm1, %v3254_v22  ;;  %2730 = vmatmul.mubr.msk.bf16.gmra.mrb[8].mxu0 %vm382_vm1, %v3195_v58 }
  0x48   : > { %2643 = vmatprep.mubr.msk.bf16.mxu1 %vm382_vm1, %v3256_v23  ;;  %2733 = vmatprep.mubr.msk.bf16.mxu0 %vm382_vm1, %v3258_v26 }
  0x4f   : > { %2644 = vmatmul.mubr.msk.bf16.gmra.mrb[12].mxu1 %vm382_vm1, %v3274_v33  ;;  %2734 = vmatmul.mubr.msk.bf16.gmra.mrb[12].mxu0 %vm382_vm1, %v1389_v34 }
  0x50   : > { %2649 = vmatprep.mubr.msk.bf16.mxu1 %vm382_vm1, %v710_v35  ;;  %2739 = vmatprep.mubr.msk.bf16.mxu0 %vm382_vm1, %v3213_v3 }
  0x57   : > { %2650 = vmatmul.mubr.msk.bf16.vlgmr.msra.gmra.mrb[0].mxu1 %vm382_vm1, %v3104_v13  ;;  %2740 = vmatmul.mubr.msk.bf16.vlgmr.msra.gmra.mrb[0].mxu0 %vm382_vm1, %v3235_v11  ;;  %v2463_v13 = vld [vmem:[%s3096_s12 + $0x81] sm:$0xff] }
  0x58   : > { %2666 = vmatpush3.bf16.msra.mxu1 %v913_v40  ;;  %2756 = vmatpush3.bf16.msra.mxu0 %v1753_v41  ;;  %v1556_v45 = vpack.c.bf16 %v2464_v44, %v2463_v13 }
  0x59   : > { %2653 = vmatprep.mubr.msk.bf16.mxu1 %vm382_vm1, %v3113_v19  ;;  %2743 = vmatprep.mubr.msk.bf16.mxu0 %vm382_vm1, %v3238_v12 }
  0x5a   : > { %2955 = vmatprep.subr.msk.bf16.mxu1 %vm407_vm0, %v2392_v42  ;;  %2960 = vmatprep.subr.msk.bf16.mxu0 %vm1950_vm2, %v1884_v43 }
  0x5f   : > { %2654 = vmatmul.mubr.msk.bf16.gmra.mrb[4].mxu1 %vm382_vm1, %v3125_v25  ;;  %2744 = vmatmul.mubr.msk.bf16.gmra.mrb[4].mxu0 %vm382_vm1, %v3254_v22 }
  0x60   : > { %2657 = vmatprep.mubr.msk.bf16.mxu1 %vm382_vm1, %v3151_v37  ;;  %2747 = vmatprep.mubr.msk.bf16.mxu0 %vm382_vm1, %v3256_v23 }
  0x67   : > { %2658 = vmatmul.mubr.msk.bf16.gmra.mrb[8].mxu1 %vm382_vm1, %v3155_v39  ;;  %2748 = vmatmul.mubr.msk.bf16.gmra.mrb[8].mxu0 %vm382_vm1, %v3274_v33 }
  0x68   : > { %2661 = vmatprep.mubr.msk.bf16.mxu1 %vm382_vm1, %v3175_v49  ;;  %2751 = vmatprep.mubr.msk.bf16.mxu0 %vm382_vm1, %v1556_v45 }
  0x6f   : > { %2662 = vmatmul.mubr.msk.bf16.gmra.mrb[12].mxu1 %vm382_vm1, %v3179_v51  ;;  %2752 = vmatmul.mubr.msk.bf16.gmra.mrb[12].mxu0 %vm382_vm1, %v1557_v52 }
  0x70   : > { %2667 = vmatprep.mubr.msk.bf16.mxu1 %vm382_vm1, %v3106_v14  ;;  %2757 = vmatprep.mubr.msk.bf16.mxu0 %vm382_vm1, %v3113_v19  ;;  %v2490_v14 = vld [vmem:[%s3096_s12 + $0x92] sm:$0xff]  ;;  %v2491_v19 = vld [vmem:[%s3096_s12 + $0x9a] sm:$0xff] }
  0x77   : > { %2668 = vmatmul.mubr.msk.bf16.vlgmr.msra.gmra.mrb[0].mxu1 %vm382_vm1, %v3123_v24  ;;  %2758 = vmatmul.mubr.msk.bf16.vlgmr.msra.gmra.mrb[0].mxu0 %vm382_vm1, %v3125_v25  ;;  %v1725_v24 = vpack.c.bf16 %v2491_v19, %v2490_v14  ;;  %v2986_v25 = vld [vmem:[%s3091_s9] sm:$0xff]  }
  0x78   : > { %2684 = vmatpush3.bf16.msra.mxu1 %v1081_v53  ;;  %2774 = vmatpush3.bf16.msra.mxu0 %v1952_v54 }
  0x79   : > { %2671 = vmatprep.mubr.msk.bf16.mxu1 %vm382_vm1, %v3148_v36  ;;  %2761 = vmatprep.mubr.msk.bf16.mxu0 %vm382_vm1, %v3151_v37  ;;  %v2987_v36 = vld [vmem:[%s3091_s9 + $0x8] sm:$0xff]   ;;  %v2988_v37 = vld [vmem:[%s3091_s9 + $0x10] sm:$0xff]  }
  0x7f   : > { %2672 = vmatmul.mubr.msk.bf16.gmra.mrb[4].mxu1 %vm382_vm1, %v3153_v38  ;;  %2762 = vmatmul.mubr.msk.bf16.gmra.mrb[4].mxu0 %vm382_vm1, %v3155_v39  ;;  %v2989_v38 = vld [vmem:[%s3091_s9 + $0x18] sm:$0xff]   ;;  %v2990_v39 = vld [vmem:[%s3091_s9 + $0x20] sm:$0xff]  }
  0x80   : > { %2675 = vmatprep.mubr.msk.bf16.mxu1 %vm382_vm1, %v3173_v48  ;;  %2765 = vmatprep.mubr.msk.bf16.mxu0 %vm382_vm1, %v3175_v49  ;;  %v2991_v48 = vld [vmem:[%s3091_s9 + $0x28] sm:$0xff]   ;;  %v2992_v49 = vld [vmem:[%s3091_s9 + $0x30] sm:$0xff]  }
  0x87   : > { %2676 = vmatmul.mubr.msk.bf16.gmra.mrb[8].mxu1 %vm382_vm1, %v3177_v50  ;;  %2766 = vmatmul.mubr.msk.bf16.gmra.mrb[8].mxu0 %vm382_vm1, %v3179_v51  ;;  %v2993_v50 = vld [vmem:[%s3091_s9 + $0x38] sm:$0xff]   ;;  %v3391_v51 = vld [vmem:[%s3442_s2] ss:$0 sm:$0xff]  ;;  %s3400_s9 = scalar_lea.vmem %s3445_s5, %s2520_s6 }
  0x88   : > { %2679 = vmatprep.mubr.msk.bf16.mxu1 %vm382_vm1, %v3195_v58  ;;  %2769 = vmatprep.mubr.msk.bf16.mxu0 %vm382_vm1, %v3197_v59 }
  0x8f   : > { %2680 = vmatmul.mubr.msk.bf16.gmra.mrb[12].mxu1 %vm382_vm1, %v3258_v26  ;;  %2770 = vmatmul.mubr.msk.bf16.gmra.mrb[12].mxu0 %vm382_vm1, %v1725_v24 }
  0x90   : > { %2685 = vmatprep.mubr.msk.bf16.mxu1 %vm382_vm1, %v3210_v1  ;;  %2775 = vmatprep.mubr.msk.bf16.mxu0 %vm1925_vm3, %v2986_v25 }
  0x97   : > { %2686 = vmatmul.mubr.msk.bf16.vlgmr.msra.gmra.mrb[0].mxu1 %vm382_vm1, %v3213_v3  ;;  %2776 = vmatmul.mubr.msk.bf16.vlgmr.msra.gmra.mrb[0].mxu0 %vm1925_vm3, %v2987_v36 }
  0x98   : > { %2689 = vmatprep.mubr.msk.bf16.mxu1 %vm382_vm1, %v3235_v11  ;;  %2779 = vmatprep.mubr.msk.bf16.mxu0 %vm1925_vm3, %v2988_v37 }
  0x9f   : > { %2690 = vmatmul.mubr.msk.bf16.gmra.mrb[4].mxu1 %vm382_vm1, %v3238_v12  ;;  %2780 = vmatmul.mubr.msk.bf16.gmra.mrb[4].mxu0 %vm1925_vm3, %v2989_v38 }
  0xa0   : > { %2693 = vmatprep.mubr.msk.bf16.mxu1 %vm382_vm1, %v3254_v22  ;;  %2783 = vmatprep.mubr.msk.bf16.mxu0 %vm1925_vm3, %v2990_v39 }
  0xa7   : > { %2694 = vmatmul.mubr.msk.bf16.gmra.mrb[8].mxu1 %vm382_vm1, %v3256_v23  ;;  %2784 = vmatmul.mubr.msk.bf16.gmra.mrb[8].mxu0 %vm1925_vm3, %v2991_v48 }
  0xa8   : > { %2697 = vmatprep.mubr.msk.bf16.mxu1 %vm382_vm1, %v3274_v33  ;;  %2787 = vmatprep.mubr.msk.bf16.mxu0 %vm1925_vm3, %v2992_v49 }
  0xaf   : > { %2698 = vmatmul.mubr.msk.bf16.gmra.mrb[12].mxu1 %vm382_vm1, %v1556_v45  ;;  %2788 = vmatmul.mubr.msk.bf16.gmra.mrb[12].mxu0 %vm1925_vm3, %v2993_v50 }
 0x16a   : > { %v2687_v55 = vpop.f32.mrb[0].mxu1  ;;  %v2777_v57 = vpop.f32.mrb[0].mxu0 }
 0x16b   : > { %v2791_v56 = vadd.f32 %v2687_v55, %v3391_v51  ;;  %v1117_v58 = vpop.f32.mrb[1].mxu1  ;;  %v1988_v60 = vpop.f32.mrb[1].mxu0 }
 0x16c   : > { %v2793_v59 = vadd.f32 %v3391_v51, %v1117_v58  ;;  %v2688_v61 = vpop.f32.mrb[2].mxu1  ;;  %v2778_v0 = vpop.f32.mrb[2].mxu0 }
 0x16d   : > { %v2792_v62 = vadd.f32 %v2791_v56, %v2777_v57  ;;  %v2795_v63 = vadd.f32 %v2688_v61, %v3391_v51  ;;  %v1120_v1 = vpop.f32.mrb[3].mxu1  ;;  %v1991_v4 = vpop.f32.mrb[3].mxu0 }
 0x16e   : > { %v2794_v2 = vadd.f32 %v2793_v59, %v1988_v60  ;;  %v2797_v3 = vadd.f32 %v3391_v51, %v1120_v1 }
 0x16f   : > { %v2069_v5 = vmax.f32 %v2792_v62, 0.0  ;;  %v2796_v6 = vadd.f32 %v2795_v63, %v2778_v0 }
 0x170   : > { %v2067_v7 = vmax.f32 %v2794_v2, 0.0  ;;  %v2798_v8 = vadd.f32 %v2797_v3, %v1991_v4 }
 0x171   : > { %2085 = vst [vmem:[%s3400_s9 + $0x10] sm:$0xff] %v2069_v5  ;;  %v2070_v9 = vmax.f32 %v2796_v6, 0.0 }
 0x172   : > { %2083 = vst [vmem:[%s3400_s9] sm:$0xff] %v2067_v7  ;;  %v2068_v10 = vmax.f32 %v2798_v8, 0.0  ;;  %v2691_v11 = vpop.f32.mrb[4].mxu1  ;;  %v2781_v15 = vpop.f32.mrb[4].mxu0 }
 0x173   : > { %2086 = vst [vmem:[%s3400_s9 + $0x18] sm:$0xff] %v2070_v9  ;;  %v2799_v12 = vadd.f32 %v2691_v11, %v3391_v51  ;;  %v1133_v16 = vpop.f32.mrb[5].mxu1  ;;  %v2004_v18 = vpop.f32.mrb[5].mxu0 }
 0x174   : > { %2084 = vst [vmem:[%s3400_s9 + $0x8] sm:$0xff] %v2068_v10  ;;  %v2801_v17 = vadd.f32 %v3391_v51, %v1133_v16  ;;  %v2692_v20 = vpop.f32.mrb[6].mxu1  ;;  %v2782_v23 = vpop.f32.mrb[6].mxu0 }
 0x175   : > { %v2800_v21 = vadd.f32 %v2799_v12, %v2781_v15  ;;  %v2803_v22 = vadd.f32 %v2692_v20, %v3391_v51  ;;  %v1136_v26 = vpop.f32.mrb[7].mxu1  ;;  %v2007_v29 = vpop.f32.mrb[7].mxu0 }
 0x176   : > { %v2802_v27 = vadd.f32 %v2801_v17, %v2004_v18  ;;  %v2805_v28 = vadd.f32 %v3391_v51, %v1136_v26 }
 0x177   : > { %v2073_v30 = vmax.f32 %v2800_v21, 0.0  ;;  %v2804_v31 = vadd.f32 %v2803_v22, %v2782_v23 }
 0x178   : > { %v2071_v32 = vmax.f32 %v2802_v27, 0.0  ;;  %v2806_v33 = vadd.f32 %v2805_v28, %v2007_v29 }
 0x179   : > { %2089 = vst [vmem:[%s3400_s9 + $0x30] sm:$0xff] %v2073_v30  ;;  %v2074_v34 = vmax.f32 %v2804_v31, 0.0 }
 0x17a   : > { %2087 = vst [vmem:[%s3400_s9 + $0x20] sm:$0xff] %v2071_v32  ;;  %v2072_v35 = vmax.f32 %v2806_v33, 0.0  ;;  %v2695_v40 = vpop.f32.mrb[8].mxu1  ;;  %v2785_v42 = vpop.f32.mrb[8].mxu0 }
 0x17b   : > { %2090 = vst [vmem:[%s3400_s9 + $0x38] sm:$0xff] %v2074_v34  ;;  %v2807_v41 = vadd.f32 %v2695_v40, %v3391_v51  ;;  %v1149_v43 = vpop.f32.mrb[9].mxu1  ;;  %v2020_v44 = vpop.f32.mrb[9].mxu0 }
 0x17c   : > { %2088 = vst [vmem:[%s3400_s9 + $0x28] sm:$0xff] %v2072_v35  ;;  %v2809_v13 = vadd.f32 %v3391_v51, %v1149_v43  ;;  %v2696_v45 = vpop.f32.mrb[10].mxu1  ;;  %v2786_v52 = vpop.f32.mrb[10].mxu0 }
 0x17d   : > { %v2808_v46 = vadd.f32 %v2807_v41, %v2785_v42  ;;  %v2811_v47 = vadd.f32 %v2696_v45, %v3391_v51  ;;  %v1152_v53 = vpop.f32.mrb[11].mxu1  ;;  %v2023_v19 = vpop.f32.mrb[11].mxu0 }
 0x17e   : > { %v2810_v54 = vadd.f32 %v2809_v13, %v2020_v44  ;;  %v2813_v14 = vadd.f32 %v3391_v51, %v1152_v53 }
 0x17f   : > { %v2077_v24 = vmax.f32 %v2808_v46, 0.0  ;;  %v2812_v25 = vadd.f32 %v2811_v47, %v2786_v52 }
 0x180   : > { %v2075_v36 = vmax.f32 %v2810_v54, 0.0  ;;  %v2814_v37 = vadd.f32 %v2813_v14, %v2023_v19 }
 0x181   : > { %2093 = vst [vmem:[%s3400_s9 + $0x50] sm:$0xff] %v2077_v24  ;;  %v2078_v38 = vmax.f32 %v2812_v25, 0.0 }
 0x182   : > { %2091 = vst [vmem:[%s3400_s9 + $0x40] sm:$0xff] %v2075_v36  ;;  %v2076_v39 = vmax.f32 %v2814_v37, 0.0  ;;  %v2699_v48 = vpop.f32.mrb[12].mxu1  ;;  %v2789_v50 = vpop.f32.mrb[12].mxu0 }
 0x183   : > { %2094 = vst [vmem:[%s3400_s9 + $0x58] sm:$0xff] %v2078_v38  ;;  %v2815_v49 = vadd.f32 %v2699_v48, %v3391_v51  ;;  %v1165_v55 = vpop.f32.mrb[13].mxu1  ;;  %v2036_v57 = vpop.f32.mrb[13].mxu0 }
 0x184   : > { %2092 = vst [vmem:[%s3400_s9 + $0x48] sm:$0xff] %v2076_v39  ;;  %v2817_v56 = vadd.f32 %v3391_v51, %v1165_v55  ;;  %v2700_v58 = vpop.f32.mrb[14].mxu1  ;;  %v2790_v61 = vpop.f32.mrb[14].mxu0 }
 0x185   : > { %v2816_v59 = vadd.f32 %v2815_v49, %v2789_v50  ;;  %v2819_v60 = vadd.f32 %v2700_v58, %v3391_v51  ;;  %v1168_v62 = vpop.f32.mrb[15].mxu1  ;;  %v2039_v1 = vpop.f32.mrb[15].mxu0 }
 0x186   : > { %v2818_v63 = vadd.f32 %v2817_v56, %v2036_v57  ;;  %v2821_v0 = vadd.f32 %v3391_v51, %v1168_v62 }
 0x187   : > { %v2081_v2 = vmax.f32 %v2816_v59, 0.0  ;;  %v2820_v3 = vadd.f32 %v2819_v60, %v2790_v61 }
 0x188   : > { %v2079_v4 = vmax.f32 %v2818_v63, 0.0  ;;  %v2822_v5 = vadd.f32 %v2821_v0, %v2039_v1 }
 0x189   : > { %2097 = vst [vmem:[%s3400_s9 + $0x70] sm:$0xff] %v2081_v2  ;;  %v2082_v6 = vmax.f32 %v2820_v3, 0.0 }
 0x18a   : > { %2095 = vst [vmem:[%s3400_s9 + $0x60] sm:$0xff] %v2079_v4  ;;  %v2080_v7 = vmax.f32 %v2822_v5, 0.0 }
 0x18b   : > { %2098 = vst [vmem:[%s3400_s9 + $0x78] sm:$0xff] %v2082_v6 }
 0x18c   : > { %2096 = vst [vmem:[%s3400_s9 + $0x68] sm:$0xff] %v2080_v7 }
 0x18d PF: > { %s15_s20 = sadd.s32 1, %s3016_s20   ;;  %s3446_s18 = smov %s3012_s19 }
 0x18e   : > { %p12_p5 = scmp.ge.s32.totalorder %s15_s20, 4   ;;  %s3447_s19 = smov %s3449_s21 }
 0x190   :  { %14 = sbr.rel (!%p12_p5) target bundleno = 2 (0x2), region = 99 }

</bundles_post_ra>
